<compile_context>
chip_gen: v7x
topology: tpu7x:2x2x1
jax: 0.10.0
libtpu: 0.0.40
codegen_flags: <defaults>
</compile_context>

<pallas_src>
import functools

import jax
import jax.numpy as jnp
from jax import lax
from jax.experimental import pallas as pl
from jax.experimental.pallas import tpu as pltpu

BACKBONE_OUT = 1000   # backbone feature width (torchvision heads emit 1000)
EXTRA_FEATS = 57      # keypoint feature width concatenated before classifier
HID1, HID2 = 256, 64  # BinaryClassifier hidden sizes


def _round_up(x: int, m: int) -> int:
    return (x + m - 1) // m * m


def _cdiv(a: int, b: int) -> int:
    return -(-a // b)


def _mutual_gaze_kernel(x_ref, f_ref,
                        wfc_ref, bfc_ref,
                        w1e_ref, w1f_ref, b1_ref,
                        w2_ref, b2_ref,
                        w3_ref, b3_ref,
                        out_ref, acc_ref, *, valid_cols: int):
    """One (batch-tile, spatial-tile) grid step.

    x_ref  : (tile_b, R, tile_x)  image chunk (streamed), R = C*fold rows
    f_ref  : (tile_b, 57)         keypoint features for this batch tile
    acc_ref: (tile_b, R) f32      running per-row spatial sum (VMEM scratch)
    out_ref: (tile_b, 1)          sigmoid probabilities for this batch tile
    valid_cols: number of valid columns (= HW/fold) along the streamed axis.
    """
    s = pl.program_id(1)
    num_s = pl.num_programs(1)
    tile_x = x_ref.shape[-1]

    # ---- init the accumulator at the first spatial chunk of each batch tile
    @pl.when(s == 0)
    def _init():
        acc_ref[...] = jnp.zeros_like(acc_ref)

    # ---- streaming spatial sum (f32 accumulation even for bf16 x) ----------
    def _accumulate(mask_tail: bool):
        xs = x_ref[...].astype(jnp.float32)               # (tile_b, R, tile_x)
        if mask_tail:
            # last block may extend past the array: OOB block contents are
            # unspecified on TPU, so zero them before accumulating.
            col = (lax.broadcasted_iota(jnp.int32, (1, 1, tile_x), 2)
                   + s * tile_x)
            xs = jnp.where(col < valid_cols, xs, 0.0)
        acc_ref[...] += jnp.sum(xs, axis=-1)               # (tile_b, R)

    if valid_cols % tile_x != 0:
        # Only the final spatial block has an invalid tail -> pay the mask
        # cost only there.
        @pl.when(s == num_s - 1)
        def _acc_tail():
            _accumulate(True)

        @pl.when(s < num_s - 1)
        def _acc_body():
            _accumulate(False)
    else:
        _accumulate(False)

    # ---- finalize: run the whole classifier head once per batch tile -------
    @pl.when(s == num_s - 1)
    def _finalize():
        sums = acc_ref[...]                                # (tile_b, R)

        # Backbone head: wfc_ref is the (R, 1000) fold-expanded, mean-scaled
        # weight, so a single MXU matmul does grouping + mean + projection.
        eye = (jnp.dot(sums, wfc_ref[...], preferred_element_type=jnp.float32)
               + bfc_ref[...])

        # Classifier layer1 on concat([eye, f]) as a split matmul:
        #   [eye | f] @ W1 == eye @ W1[:1000] + f @ W1[1000:]
        h1 = (jnp.dot(eye, w1e_ref[...], preferred_element_type=jnp.float32)
              + jnp.dot(f_ref[...].astype(jnp.float32), w1f_ref[...],
                        preferred_element_type=jnp.float32)
              + b1_ref[...])
        h1 = jnp.maximum(h1, 0.0)        # Dropout(0.1) -> identity (eval); ReLU

        h2 = (jnp.dot(h1, w2_ref[...], preferred_element_type=jnp.float32)
              + b2_ref[...])
        h2 = jnp.maximum(h2, 0.0)        # Dropout(0.1) -> identity (eval); ReLU

        # layer3 (64 -> 1): VPU multiply + lane reduction (w3 is a (1, 64) row).
        logits = jnp.sum(h2 * w3_ref[...], axis=-1, keepdims=True) + b3_ref[...]
        out_ref[...] = jax.nn.sigmoid(logits)


def _pick_fold(C: int, HW: int) -> int:
    """Spatial->sublane fold so C*fold rows pack VMEM sublanes densely."""
    for f in range(1, 9):                       # perfect: C*f multiple of 8
        if HW % f == 0 and (C * f) % 8 == 0:
            return f
    for f in range(max(1, 8 // max(C, 1)), 0, -1):   # partial densification
        if HW % f == 0:
            return f
    return 1


def _pick_tile_b(B: int) -> int:
    if B <= 8:
        return 8
    cap = 128
    if B >= 16:
        # force >= 2 batch tiles so both v7x TensorCores get work
        cap = min(cap, _round_up(_cdiv(B, 2), 8))
    tile_b = min(cap, _round_up(B, 8))
    # keep batch-padding waste under ~12.5 % (padded rows are real DMA traffic)
    while tile_b > 8 and (_round_up(B, tile_b) - B) * 8 > B:
        tile_b -= 8
    return tile_b


def _pick_tile_x(S: int, tile_b: int, rows_pad: int, itemsize: int,
                 x_buf_bytes: int):
    """Largest lane-tile (multiple of 128) fitting the per-buffer VMEM budget."""
    max_tile_x = max(128,
                     (x_buf_bytes // (tile_b * rows_pad * itemsize)) // 128 * 128)
    if S <= max_tile_x:
        return S, 1                              # full extent: always legal
    ns0 = _cdiv(S, max_tile_x)
    best_tx, best_cols = None, None
    for ns in range(ns0, ns0 + 8):               # prefer splits with least waste
        tx = _round_up(_cdiv(S, ns), 128)
        cols = _cdiv(S, tx) * tx                 # columns actually DMA'd
        if best_cols is None or cols < best_cols:
            best_tx, best_cols = tx, cols
    return best_tx, _cdiv(S, best_tx)


def mutual_gaze_detector_ope(x_nchw, f, params, *,
                             x_buf_bytes: int = 10 * 1024 * 1024):
    """Forward pass.  x_nchw: (B, C, H, W) image, f: (B, 57) features."""
    B, C, H, W = x_nchw.shape
    HW = H * W
    inv_hw = 1.0 / float(HW)

    fold = _pick_fold(C, HW)
    R = C * fold                  # rows per image after the fold
    S = HW // fold                # columns per row

    tile_b = _pick_tile_b(B)
    num_b = _cdiv(B, tile_b)
    b_pad = num_b * tile_b

    itemsize = jnp.dtype(x_nchw.dtype).itemsize
    tile_x, num_s = _pick_tile_x(S, tile_b, _round_up(R, 8), itemsize,
                                 x_buf_bytes)

    # Free, contiguous reshape (no data movement, no pad, no cast).
    x_view = x_nchw.reshape(B, R, S)

    # Fold the 1/HW mean scale and the fold-row grouping into the backbone
    # head weight: tiny (R, 1000) array, built once per call outside the
    # streaming loop.  eye = spatial_sums @ wfc_fold + bfc == pooled @ wfc + bfc.
    wfc_fold = jnp.repeat(params["wfc"], fold, axis=0) * inv_hw

    def resident(shape):
        # Full-extent block + constant index map -> DMA'd once, VMEM-resident.
        return pl.BlockSpec(shape, lambda i, s: (0,) * len(shape))

    in_specs = [
        pl.BlockSpec((tile_b, R, tile_x), lambda i, s: (i, 0, s)),   # x (streamed)
        pl.BlockSpec((tile_b, EXTRA_FEATS), lambda i, s: (i, 0)),    # f
        resident((R, BACKBONE_OUT)),        # wfc (fold-expanded, mean-scaled)
        resident((1, BACKBONE_OUT)),        # bfc
        resident((BACKBONE_OUT, HID1)),     # w1e
        resident((EXTRA_FEATS, HID1)),      # w1f
        resident((1, HID1)),                # b1
        resident((HID1, HID2)),             # w2
        resident((1, HID2)),                # b2
        resident((1, HID2)),                # w3 (row vector for VPU epilogue)
        resident((1, 1)),                   # b3
    ]
    out_spec = pl.BlockSpec((tile_b, 1), lambda i, s: (i, 0))

    x_buf = tile_b * _round_up(R, 8) * tile_x * itemsize
    vmem_limit = int(min(64 * 1024 * 1024,
                         max(32 * 1024 * 1024, 2 * x_buf + 8 * 1024 * 1024)))

    kernel = functools.partial(_mutual_gaze_kernel, valid_cols=S)
    out_padded = pl.pallas_call(
        kernel,
        grid_spec=pltpu.PrefetchScalarGridSpec(
            num_scalar_prefetch=0,
            grid=(num_b, num_s),
            in_specs=in_specs,
            out_specs=out_spec,
            scratch_shapes=[pltpu.VMEM((tile_b, R), jnp.float32)],
        ),
        out_shape=jax.ShapeDtypeStruct((b_pad, 1), jnp.float32),
        compiler_params=pltpu.CompilerParams(
            dimension_semantics=("parallel", "arbitrary"),
            vmem_limit_bytes=vmem_limit),
    )(x_view, f,
      wfc_fold, params["bfc"],
      params["w1e"], params["w1f"], params["b1"],
      params["w2"], params["b2"],
      params["w3"], params["b3"])
    # Rows >= B of the padded output come from clipped/garbage batch-tail
    # blocks and are discarded here (row-local math, so valid rows are exact).
    return out_padded[:B]


def init_params(key, in_channels):
    ks = jax.random.split(key, 5)

    def lin(k, fan_in, fan_out):
        scale = 1.0 / jnp.sqrt(jnp.float32(fan_in))
        return jax.random.uniform(k, (fan_in, fan_out), jnp.float32, -scale, scale)

    return {
        # synthetic backbone head: C -> 1000
        "wfc": lin(ks[0], in_channels, BACKBONE_OUT),
        "bfc": jnp.zeros((1, BACKBONE_OUT), jnp.float32),
        # classifier layer1: Linear(1057, 256) split into eye / f row blocks
        "w1e": lin(ks[1], BACKBONE_OUT, HID1),
        "w1f": lin(ks[2], EXTRA_FEATS, HID1),
        "b1": 0.01 * jnp.ones((1, HID1), jnp.float32),
        # layer2: Linear(256, 64)
        "w2": lin(ks[3], HID1, HID2),
        "b2": 0.01 * jnp.ones((1, HID2), jnp.float32),
        # layer3: Linear(64, 1) -- stored as a (1, 64) row for the VPU epilogue
        "w3": lin(ks[4], HID2, 1).reshape(1, HID2),
        "b3": jnp.zeros((1, 1), jnp.float32),
    }


def reference_forward(x_nchw, f, params):
    """Pure-JAX reference of the same synthetic forward pass."""
    B, C, H, W = x_nchw.shape
    pooled = jnp.mean(x_nchw.reshape(B, C, H * W), axis=-1)
    eye = pooled @ params["wfc"] + params["bfc"]
    h1 = jnp.maximum(eye @ params["w1e"] + f @ params["w1f"] + params["b1"], 0.0)
    h2 = jnp.maximum(h1 @ params["w2"] + params["b2"], 0.0)
    logits = h2 @ params["w3"].T + params["b3"]
    return jax.nn.sigmoid(logits)


if __name__ == "__main__":
    key = jax.random.PRNGKey(0)
    k_x, k_f, k_p, k_x2, k_f2, k_p2 = jax.random.split(key, 6)

    # Case 1: small synthetic batch (single spatial step, fold=2, dense rows).
    B, C, H, W = 2, 4, 16, 16
    x = jax.random.normal(k_x, (B, C, H, W), jnp.float32)
    f = jax.random.normal(k_f, (B, EXTRA_FEATS), jnp.float32)
    params = init_params(k_p, C)

    out = mutual_gaze_detector_ope(x, f, params)
    jax.block_until_ready(out)
    assert out.shape == (B, 1) and out.dtype == jnp.float32
    ref = reference_forward(x, f, params)
    assert jnp.allclose(out, ref, atol=2e-3, rtol=2e-3), \
        float(jnp.max(jnp.abs(out - ref)))

    # Case 2: exercises multi-step streaming, ragged spatial-tail masking,
    # fold=8 row packing, and a partial batch tile (B=10, C=3, 36x36).
    B2, C2, H2, W2 = 10, 3, 36, 36
    x2 = jax.random.normal(k_x2, (B2, C2, H2, W2), jnp.float32)
    f2 = jax.random.normal(k_f2, (B2, EXTRA_FEATS), jnp.float32)
    params2 = init_params(k_p2, C2)

    out2 = mutual_gaze_detector_ope(x2, f2, params2, x_buf_bytes=64 * 1024)
    jax.block_until_ready(out2)
    assert out2.shape == (B2, 1)
    ref2 = reference_forward(x2, f2, params2)
    assert jnp.allclose(out2, ref2, atol=2e-3, rtol=2e-3), \
        float(jnp.max(jnp.abs(out2 - ref2)))

    print("KERNEL_OK")
</pallas_src>

<mosaic_0001>
module attributes {stable_mosaic.version = 11 : i64} {
  func.func @_mutual_gaze_kernel(%arg0: i32, %arg1: i32, %arg2: memref<8x8x128xf32, #tpu.memory_space<vmem>>, %arg3: memref<8x57xf32, #tpu.memory_space<vmem>>, %arg4: memref<8x1000xf32, #tpu.memory_space<vmem>>, %arg5: memref<1x1000xf32, #tpu.memory_space<vmem>>, %arg6: memref<1000x256xf32, #tpu.memory_space<vmem>>, %arg7: memref<57x256xf32, #tpu.memory_space<vmem>>, %arg8: memref<1x256xf32, #tpu.memory_space<vmem>>, %arg9: memref<256x64xf32, #tpu.memory_space<vmem>>, %arg10: memref<1x64xf32, #tpu.memory_space<vmem>>, %arg11: memref<1x64xf32, #tpu.memory_space<vmem>>, %arg12: memref<1x1xf32, #tpu.memory_space<vmem>>, %arg13: memref<8x1xf32, #tpu.memory_space<vmem>>, %arg14: memref<8x8xf32, #tpu.memory_space<vmem>>) attributes {dimension_semantics = [#tpu.dimension_semantics<parallel>, #tpu.dimension_semantics<arbitrary>], iteration_bounds = array<i64: 1, 1>, scalar_prefetch = 0 : i64, scratch_operands = 1 : i64, tpu.core_type = #tpu.core_type<tc>, window_params = [{transform_indices = @transform_0, window_bounds = array<i64: 8, 8, 128>}, {transform_indices = @transform_1, window_bounds = array<i64: 8, 57>}, {pipeline_mode = #tpu.pipeline_mode<synchronous>, transform_indices = @transform_2, window_bounds = array<i64: 8, 1000>}, {pipeline_mode = #tpu.pipeline_mode<synchronous>, transform_indices = @transform_3, window_bounds = array<i64: 1, 1000>}, {pipeline_mode = #tpu.pipeline_mode<synchronous>, transform_indices = @transform_4, window_bounds = array<i64: 1000, 256>}, {pipeline_mode = #tpu.pipeline_mode<synchronous>, transform_indices = @transform_5, window_bounds = array<i64: 57, 256>}, {pipeline_mode = #tpu.pipeline_mode<synchronous>, transform_indices = @transform_6, window_bounds = array<i64: 1, 256>}, {pipeline_mode = #tpu.pipeline_mode<synchronous>, transform_indices = @transform_7, window_bounds = array<i64: 256, 64>}, {pipeline_mode = #tpu.pipeline_mode<synchronous>, transform_indices = @transform_8, window_bounds = array<i64: 1, 64>}, {pipeline_mode = #tpu.pipeline_mode<synchronous>, transform_indices = @transform_9, window_bounds = array<i64: 1, 64>}, {pipeline_mode = #tpu.pipeline_mode<synchronous>, transform_indices = @transform_10, window_bounds = array<i64: 1, 1>}, {transform_indices = @transform_11, window_bounds = array<i64: 8, 1>}]} {
    %c0_i32 = arith.constant 0 : i32
    %0 = arith.cmpi eq, %arg1, %c0_i32 : i32
    %1 = arith.extui %0 : i1 to i32
    %c0_i32_0 = arith.constant 0 : i32
    %2 = arith.cmpi ne, %1, %c0_i32_0 : i32
    scf.if %2 {
      %cst_9 = arith.constant 0.000000e+00 : f32
      %11 = vector.broadcast %cst_9 : f32 to vector<8x8xf32>
      %c0_10 = arith.constant 0 : index
      %c0_11 = arith.constant 0 : index
      %12 = vector.load %arg14[%c0_10, %c0_11] : memref<8x8xf32, #tpu.memory_space<vmem>>, vector<8x8xf32>
      tpu.vector_store %arg14[%c0_10, %c0_11], %11 {strides = array<i32>} : memref<8x8xf32, #tpu.memory_space<vmem>>, vector<8x8xf32>,
    } else {
    }
    %c0 = arith.constant 0 : index
    %c0_1 = arith.constant 0 : index
    %c0_2 = arith.constant 0 : index
    %3 = vector.load %arg2[%c0, %c0_1, %c0_2] : memref<8x8x128xf32, #tpu.memory_space<vmem>>, vector<8x8x128xf32>
    %c0_3 = arith.constant 0 : index
    %c0_4 = arith.constant 0 : index
    %4 = vector.load %arg14[%c0_3, %c0_4] : memref<8x8xf32, #tpu.memory_space<vmem>>, vector<8x8xf32>
    %cst = arith.constant dense<0.000000e+00> : vector<8x8xf32>
    %5 = vector.multi_reduction <add>, %3, %cst [2] : vector<8x8x128xf32> to vector<8x8xf32>
    %6 = arith.addf %4, %5 : vector<8x8xf32>
    %c0_5 = arith.constant 0 : index
    %c0_6 = arith.constant 0 : index
    %7 = vector.load %arg14[%c0_5, %c0_6] : memref<8x8xf32, #tpu.memory_space<vmem>>, vector<8x8xf32>
    tpu.vector_store %arg14[%c0_5, %c0_6], %6 {strides = array<i32>} : memref<8x8xf32, #tpu.memory_space<vmem>>, vector<8x8xf32>,
    %c0_i32_7 = arith.constant 0 : i32
    %8 = arith.cmpi eq, %arg1, %c0_i32_7 : i32
    %9 = arith.extui %8 : i1 to i32
    %c0_i32_8 = arith.constant 0 : i32
    %10 = arith.cmpi ne, %9, %c0_i32_8 : i32
    scf.if %10 {
      %c0_9 = arith.constant 0 : index
      %c0_10 = arith.constant 0 : index
      %11 = vector.load %arg14[%c0_9, %c0_10] : memref<8x8xf32, #tpu.memory_space<vmem>>, vector<8x8xf32>
      %c0_11 = arith.constant 0 : index
      %c0_12 = arith.constant 0 : index
      %12 = vector.load %arg4[%c0_11, %c0_12] : memref<8x1000xf32, #tpu.memory_space<vmem>>, vector<8x1000xf32>
      %cst_13 = arith.constant dense<0.000000e+00> : vector<8x1000xf32>
      %13 = tpu.matmul %11, %12, %cst_13 {dimension_numbers = #tpu.dot_dimension_numbers<[1], [0], [0], [1], [0, 0, 1, 1], [], []>} : vector<8x8xf32>, vector<8x1000xf32>, vector<8x1000xf32> -> vector<8x1000xf32>
      %c0_14 = arith.constant 0 : index
      %c0_15 = arith.constant 0 : index
      %14 = vector.load %arg5[%c0_14, %c0_15] : memref<1x1000xf32, #tpu.memory_space<vmem>>, vector<1x1000xf32>
      %15 = vector.broadcast %14 : vector<1x1000xf32> to vector<8x1000xf32>
      %16 = arith.addf %13, %15 : vector<8x1000xf32>
      %c0_16 = arith.constant 0 : index
      %c0_17 = arith.constant 0 : index
      %17 = vector.load %arg6[%c0_16, %c0_17] : memref<1000x256xf32, #tpu.memory_space<vmem>>, vector<1000x256xf32>
      %cst_18 = arith.constant dense<0.000000e+00> : vector<8x256xf32>
      %18 = tpu.matmul %16, %17, %cst_18 {dimension_numbers = #tpu.dot_dimension_numbers<[1], [0], [0], [1], [0, 0, 1, 1], [], []>} : vector<8x1000xf32>, vector<1000x256xf32>, vector<8x256xf32> -> vector<8x256xf32>
      %c0_19 = arith.constant 0 : index
      %c0_20 = arith.constant 0 : index
      %19 = vector.load %arg3[%c0_19, %c0_20] : memref<8x57xf32, #tpu.memory_space<vmem>>, vector<8x57xf32>
      %c0_21 = arith.constant 0 : index
      %c0_22 = arith.constant 0 : index
      %20 = vector.load %arg7[%c0_21, %c0_22] : memref<57x256xf32, #tpu.memory_space<vmem>>, vector<57x256xf32>
      %cst_23 = arith.constant dense<0.000000e+00> : vector<8x256xf32>
      %21 = tpu.matmul %19, %20, %cst_23 {dimension_numbers = #tpu.dot_dimension_numbers<[1], [0], [0], [1], [0, 0, 1, 1], [], []>} : vector<8x57xf32>, vector<57x256xf32>, vector<8x256xf32> -> vector<8x256xf32>
      %22 = arith.addf %18, %21 : vector<8x256xf32>
      %c0_24 = arith.constant 0 : index
      %c0_25 = arith.constant 0 : index
      %23 = vector.load %arg8[%c0_24, %c0_25] : memref<1x256xf32, #tpu.memory_space<vmem>>, vector<1x256xf32>
      %24 = vector.broadcast %23 : vector<1x256xf32> to vector<8x256xf32>
      %25 = arith.addf %22, %24 : vector<8x256xf32>
      %cst_26 = arith.constant 0.000000e+00 : f32
      %26 = vector.broadcast %cst_26 : f32 to vector<8x256xf32>
      %27 = arith.maximumf %25, %26 : vector<8x256xf32>
      %c0_27 = arith.constant 0 : index
      %c0_28 = arith.constant 0 : index
      %28 = vector.load %arg9[%c0_27, %c0_28] : memref<256x64xf32, #tpu.memory_space<vmem>>, vector<256x64xf32>
      %cst_29 = arith.constant dense<0.000000e+00> : vector<8x64xf32>
      %29 = tpu.matmul %27, %28, %cst_29 {dimension_numbers = #tpu.dot_dimension_numbers<[1], [0], [0], [1], [0, 0, 1, 1], [], []>} : vector<8x256xf32>, vector<256x64xf32>, vector<8x64xf32> -> vector<8x64xf32>
      %c0_30 = arith.constant 0 : index
      %c0_31 = arith.constant 0 : index
      %30 = vector.load %arg10[%c0_30, %c0_31] : memref<1x64xf32, #tpu.memory_space<vmem>>, vector<1x64xf32>
      %31 = vector.broadcast %30 : vector<1x64xf32> to vector<8x64xf32>
      %32 = arith.addf %29, %31 : vector<8x64xf32>
      %cst_32 = arith.constant 0.000000e+00 : f32
      %33 = vector.broadcast %cst_32 : f32 to vector<8x64xf32>
      %34 = arith.maximumf %32, %33 : vector<8x64xf32>
      %c0_33 = arith.constant 0 : index
      %c0_34 = arith.constant 0 : index
      %35 = vector.load %arg11[%c0_33, %c0_34] : memref<1x64xf32, #tpu.memory_space<vmem>>, vector<1x64xf32>
      %36 = vector.broadcast %35 : vector<1x64xf32> to vector<8x64xf32>
      %37 = arith.mulf %34, %36 : vector<8x64xf32>
      %cst_35 = arith.constant dense<0.000000e+00> : vector<8xf32>
      %38 = vector.multi_reduction <add>, %37, %cst_35 [1] : vector<8x64xf32> to vector<8xf32>
      %39 = vector.shape_cast %38 : vector<8xf32> to vector<8x1xf32>
      %c0_36 = arith.constant 0 : index
      %c0_37 = arith.constant 0 : index
      %40 = vector.load %arg12[%c0_36, %c0_37] : memref<1x1xf32, #tpu.memory_space<vmem>>, vector<1x1xf32>
      %41 = vector.broadcast %40 : vector<1x1xf32> to vector<8x1xf32>
      %42 = arith.addf %39, %41 : vector<8x1xf32>
      %43 = arith.negf %42 : vector<8x1xf32>
      %44 = math.exp %43 : vector<8x1xf32>
      %cst_38 = arith.constant 1.000000e+00 : f32
      %45 = vector.broadcast %cst_38 : f32 to vector<8x1xf32>
      %46 = arith.addf %45, %44 : vector<8x1xf32>
      %47 = arith.divf %45, %46 : vector<8x1xf32>
      %c0_39 = arith.constant 0 : index
      %c0_40 = arith.constant 0 : index
      %48 = vector.load %arg13[%c0_39, %c0_40] : memref<8x1xf32, #tpu.memory_space<vmem>>, vector<8x1xf32>
      tpu.vector_store %arg13[%c0_39, %c0_40], %47 {strides = array<i32>} : memref<8x1xf32, #tpu.memory_space<vmem>>, vector<8x1xf32>,
    } else {
    }
    return
  }
  func.func @transform_0(%arg0: i32, %arg1: i32) -> (i32, i32, i32) {
    %c0_i32 = arith.constant 0 : i32
    %c0_i32_0 = arith.constant 0 : i32
    return %arg0, %c0_i32, %arg1 : i32, i32, i32
  }
  func.func @transform_1(%arg0: i32, %arg1: i32) -> (i32, i32) {
    %c0_i32 = arith.constant 0 : i32
    %c0_i32_0 = arith.constant 0 : i32
    return %arg0, %c0_i32 : i32, i32
  }
  func.func @transform_2(%arg0: i32, %arg1: i32) -> (i32, i32) {
    %c0_i32 = arith.constant 0 : i32
    %c0_i32_0 = arith.constant 0 : i32
    %c0_i32_1 = arith.constant 0 : i32
    return %c0_i32, %c0_i32_0 : i32, i32
  }
  func.func @transform_3(%arg0: i32, %arg1: i32) -> (i32, i32) {
    %c0_i32 = arith.constant 0 : i32
    %c0_i32_0 = arith.constant 0 : i32
    %c0_i32_1 = arith.constant 0 : i32
    return %c0_i32, %c0_i32_0 : i32, i32
  }
  func.func @transform_4(%arg0: i32, %arg1: i32) -> (i32, i32) {
    %c0_i32 = arith.constant 0 : i32
    %c0_i32_0 = arith.constant 0 : i32
    %c0_i32_1 = arith.constant 0 : i32
    return %c0_i32, %c0_i32_0 : i32, i32
  }
  func.func @transform_5(%arg0: i32, %arg1: i32) -> (i32, i32) {
    %c0_i32 = arith.constant 0 : i32
    %c0_i32_0 = arith.constant 0 : i32
    %c0_i32_1 = arith.constant 0 : i32
    return %c0_i32, %c0_i32_0 : i32, i32
  }
  func.func @transform_6(%arg0: i32, %arg1: i32) -> (i32, i32) {
    %c0_i32 = arith.constant 0 : i32
    %c0_i32_0 = arith.constant 0 : i32
    %c0_i32_1 = arith.constant 0 : i32
    return %c0_i32, %c0_i32_0 : i32, i32
  }
  func.func @transform_7(%arg0: i32, %arg1: i32) -> (i32, i32) {
    %c0_i32 = arith.constant 0 : i32
    %c0_i32_0 = arith.constant 0 : i32
    %c0_i32_1 = arith.constant 0 : i32
    return %c0_i32, %c0_i32_0 : i32, i32
  }
  func.func @transform_8(%arg0: i32, %arg1: i32) -> (i32, i32) {
    %c0_i32 = arith.constant 0 : i32
    %c0_i32_0 = arith.constant 0 : i32
    %c0_i32_1 = arith.constant 0 : i32
    return %c0_i32, %c0_i32_0 : i32, i32
  }
  func.func @transform_9(%arg0: i32, %arg1: i32) -> (i32, i32) {
    %c0_i32 = arith.constant 0 : i32
    %c0_i32_0 = arith.constant 0 : i32
    %c0_i32_1 = arith.constant 0 : i32
    return %c0_i32, %c0_i32_0 : i32, i32
  }
  func.func @transform_10(%arg0: i32, %arg1: i32) -> (i32, i32) {
    %c0_i32 = arith.constant 0 : i32
    %c0_i32_0 = arith.constant 0 : i32
    %c0_i32_1 = arith.constant 0 : i32
    return %c0_i32, %c0_i32_0 : i32, i32
  }
  func.func @transform_11(%arg0: i32, %arg1: i32) -> (i32, i32) {
    %c0_i32 = arith.constant 0 : i32
    %c0_i32_0 = arith.constant 0 : i32
    return %arg0, %c0_i32 : i32, i32
  }
}

</mosaic_0001>

<bundles_post_ra>
// kernel: tpu_custom_call.1
= control target key start
LH: loop header
LB: loop body
LE: loop exit
PB: predicated region body
PF: predicated region fallthrough
CT: control target
= control target key end

     0   :  { %s2020_s0 = inlined_call_operand.vmem [shape: f32[2,8,128], index: 0, kind: input, shape index: {}]   ;;  %s2021_s1 = inlined_call_operand.vmem [shape: f32[2,57], index: 1, kind: input, shape index: {}]   ;;  %s2022_s2 = inlined_call_operand.vmem [shape: f32[8,1000], index: 2, kind: input, shape index: {}]   ;;  %s2023_s3 = inlined_call_operand.vmem [shape: f32[1,1000], index: 3, kind: input, shape index: {}]   ;;  %s2024_s4 = inlined_call_operand.hbm [shape: f32[1000,256], index: 4, kind: input, shape index: {}]   ;;  %s2025_s5 = inlined_call_operand.vmem [shape: f32[57,256], index: 5, kind: input, shape index: {}]   ;;  %s2026_s6 = inlined_call_operand.vmem [shape: f32[1,256], index: 6, kind: input, shape index: {}]   ;;  %s2027_s7 = inlined_call_operand.vmem [shape: f32[256,64], index: 7, kind: input, shape index: {}]   ;;  %s2028_s8 = inlined_call_operand.vmem [shape: f32[1,64], index: 8, kind: input, shape index: {}]   ;;  %s2029_s9 = inlined_call_operand.vmem [shape: f32[1,64], index: 9, kind: input, shape index: {}]   ;;  %s2030_s10 = inlined_call_operand.<no memory space> [shape: f32[1,1], index: 10, kind: input, shape index: {}]   ;;  %s2031_s11 = inlined_call_operand.vmem [shape: f32[8,1], index: 11, kind: output, shape index: {}]  }
   0x1   :  { %v16_v0 = vstv %s2030_s10 }
   0x2   :  { %17 = vst [vmem:[#allocation3] sm:$0x1] %v16_v0 }
   0x3   :  { %18 = vsyncpa [#allocation5], 0  ;;  %s1668_s19 = smov [#allocation4]   ;;  %s1644_s23 = scalar_lea.hbm %s2024_s4, 32000 }
   0x4   :  { %s32_s20 = sshll.u32 %s1668_s19, 4  ;;  %p1645_p0 = scmp.ne.s32.totalorder %s2024_s4, %s1644_s23  ;;  %s33_s20 = int_to_ptr.vmem [resolvable:$true] %s32_s20 }
   0x5   :  { %p1648_p1 = scmp.lt.u32.totalorder %s1644_s23, %s2024_s4 }
   0x7   :  { %p1650_p2 = pnand %p1648_p1, %p1645_p0 }
   0x9   :  { %1653 = shalt.err (!%p1650_p2)
}
   0xa   :  { %s1654_s10 = scalar_lea.vmem %s33_s20, 32000  ;;  %p1659_p4 = scmp.lt.s32.totalorder %s33_s20, %s33_s20 }
   0xb   :  { %p1655_p3 = scmp.ne.s32.totalorder %s33_s20, %s1654_s10  ;;  %p1660_p5 = scmp.lt.s32.totalorder %s1654_s10, %s1654_s10 }
   0xd   :  { %p1661_p6 = por %p1660_p5, %p1659_p4 }
   0xf   :  { %p1662_p7 = pnand %p1661_p6, %p1655_p3 }
  0x11   :  { %1665 = shalt.err (!%p1662_p7)
}
  0x12   :  { %s1669_s28 = smov 256   ;;  %s1670_s29 = smov 16  }
  0x13   :  { %38 = dma.hbm_to_vmem [thread:$0]  %s2024_s4, 32000, %s33_s20, [#allocation5], %s1669_s28, %s1669_s28, %s1670_s29  }
  0x14   :  { %1666 = dma.done.wait [#allocation5], 32000  }
  0x15   :  { %1667 = vsyncadd [#allocation5], 4294935296  ;;  %v60_v1 = vld [vmem:[%s2020_s0] sm:$0xff]  ;;  %v62_v2 = vld [vmem:[%s2020_s0 + $0x10] sm:$0xff]  ;;  %vm58_vm0 = vcmask 64512   ;;  %v1671_v9 = vmov 0.0   ;;  %v93_v18 = vlaneseq }
  0x16   :  { %69 = vadd.xlane.f32.xlu0 %v60_v1  ;;  %73 = vadd.xlane.f32.xlu1 %v62_v2  ;;  %v61_v3 = vld [vmem:[%s2020_s0 + $0x8] sm:$0xff]  ;;  %v63_v4 = vld [vmem:[%s2020_s0 + $0x18] sm:$0xff]  ;;  %v64_v5 = vld [vmem:[%s2020_s0 + $0x20] sm:$0xff]  ;;  %59 = vst.msk [vmem:[#allocation2] sm:$0xff] %vm58_vm0, %v1671_v9  ;;  %vm127_vm1 = vcmask 1041409   ;;  %vm129_vm2 = vcmask 1042434  }
  0x17   :  { %v65_v6 = vld [vmem:[%s2020_s0 + $0x28] sm:$0xff]  ;;  %v66_v7 = vld [vmem:[%s2020_s0 + $0x30] sm:$0xff]  ;;  %v67_v8 = vld [vmem:[%s2020_s0 + $0x38] sm:$0xff]  ;;  %266 = vmatprep.mubr.f32.mxu0 %v1671_v9  ;;  %479 = vmatprep.mubr.f32.mxu1 %v1671_v9  ;;  %v94_v19 = vand.u32 127, %v93_v18  ;;  %v1791_v20 = vshrl.u32 %v93_v18, 7  ;;  %vm131_vm3 = vcmask 1043459  }
  0x18   :  { %v150_v10 = vld [vmem:[%s2022_s2 + $0x8] sm:$0xff]  ;;  %v149_v11 = vld [vmem:[%s2022_s2] sm:$0xff]  ;;  %v156_v12 = vld [vmem:[%s2022_s2 + $0x38] sm:$0xff]  ;;  %vm133_vm4 = vcmask 1044484   ;;  %vm135_vm5 = vcmask 1045509   ;;  %vm137_vm6 = vcmask 1046534  }
  0x19   :  { %202 = vmatprep.subr.mxu0 %v150_v10  ;;  %415 = vmatprep.subr.mxu1 %v156_v12  ;;  %v152_v13 = vld [vmem:[%s2022_s2 + $0x18] sm:$0xff]  ;;  %v155_v14 = vld [vmem:[%s2022_s2 + $0x30] sm:$0xff]  ;;  %v489_v16 = vld [vmem:[#allocation4 + $0x18] sm:$0xff]  ;;  %v97_v23 = vsub.s32 %v94_v19, %v1791_v20  ;;  %vm139_vm7 = vcmask 1047559   ;;  %vm757_vm8 = vcmask 1040384   ;;  %vm1672_vm9 = vmmov 1  }
  0x1a   :  { %71 = vadd.xlane.f32.xlu0 %v61_v3  ;;  %75 = vadd.xlane.f32.xlu1 %v63_v4  ;;  %v487_v15 = vld [vmem:[#allocation4 + $0x8] sm:$0xff]  ;;  %v486_v47 = vld [vmem:[#allocation4] sm:$0xff]  ;;  %v488_v48 = vld [vmem:[#allocation4 + $0x10] sm:$0xff]  ;;  %vm753_vm11 = vcmask 465920   ;;  %vm835_vm12 = vcmask 850944   ;;  %vm1257_vm13 = vcmask 523264  }
  0x1b   :  { %203 = vmatpush1.msra.mxu0 %v149_v11  ;;  %416 = vmatpush1.msra.mxu1 %v155_v14  ;;  %v1347_v17 = vpack.c.bf16 %v489_v16, %v487_v15  ;;  %v491_v49 = vld [vmem:[#allocation4 + $0x28] sm:$0xff]  ;;  %v493_v50 = vld [vmem:[#allocation4 + $0x38] sm:$0xff]  ;;  %v1349_v55 = vpack.c.bf16 %v488_v48, %v486_v47  ;;  %v490_v58 = vld [vmem:[#allocation4 + $0x20] sm:$0xff]  ;;  %vm1275_vm14 = vcmask 7168  }
  0x1c   :  { %273 = vmatprep.subr.mxu0 %v152_v13  ;;  %v151_v51 = vld [vmem:[%s2022_s2 + $0x10] sm:$0xff]  ;;  %v154_v52 = vld [vmem:[%s2022_s2 + $0x28] sm:$0xff]  ;;  %v740_v54 = vld [vmem:[%s2025_s5 + $0x18] sm:$0xff]  ;;  %v1351_v57 = vpack.c.bf16 %v493_v50, %v491_v49 }
  0x1d   :  { %1348 = vmatprep.subr.bf16.mxu1 %v1347_v17  ;;  %v68_v43 = vld [vmem:[#allocation2] sm:$0xff]  ;;  %v738_v53 = vld [vmem:[%s2025_s5 + $0x8] sm:$0xff]  ;;  %v495_v60 = vld [vmem:[#allocation4 + $0x48] sm:$0xff] }
  0x1e   :  { %77 = vadd.xlane.f32.xlu0 %v64_v5  ;;  %79 = vadd.xlane.f32.xlu1 %v65_v6  ;;  %v492_v59 = vld [vmem:[#allocation4 + $0x30] sm:$0xff]  ;;  %v497_v61 = vld [vmem:[#allocation4 + $0x58] sm:$0xff]  ;;  %v1329_v63 = vpack.c.bf16 %v740_v54, %v738_v53  ;;  %v739_v1 = vld [vmem:[%s2025_s5 + $0x10] sm:$0xff] }
  0x1f   :  { %v153_v62 = vld [vmem:[%s2022_s2 + $0x20] sm:$0xff]  ;;  %v742_v2 = vld [vmem:[%s2025_s5 + $0x28] sm:$0xff]  ;;  %v1353_v3 = vpack.c.bf16 %v492_v59, %v490_v58  ;;  %v744_v4 = vld [vmem:[%s2025_s5 + $0x38] sm:$0xff]  ;;  %v1355_v5 = vpack.c.bf16 %v497_v61, %v495_v60 }
  0x20   :  { %v737_v0 = vld [vmem:[%s2025_s5] sm:$0xff]  ;;  %v494_v6 = vld [vmem:[#allocation4 + $0x40] sm:$0xff]  ;;  %v1333_v12 = vpack.c.bf16 %v744_v4, %v742_v2  ;;  %v748_v17 = vld [vmem:[%s2025_s5 + $0x58] sm:$0xff] }
  0x21   :  { %v501_v10 = vld [vmem:[#allocation4 + $0x78] sm:$0xff]  ;;  %v1331_v11 = vpack.c.bf16 %v739_v1, %v737_v0  ;;  %v743_v14 = vld [vmem:[%s2025_s5 + $0x30] sm:$0xff]  ;;  %vm1853_vm10 = vmpackc.low %vm757_vm8, %vm1672_vm9 }
  0x22   :  { %81 = vadd.xlane.f32.xlu0 %v66_v7  ;;  %83 = vadd.xlane.f32.xlu1 %v67_v8  ;;  %v496_v7 = vld [vmem:[#allocation4 + $0x50] sm:$0xff]  ;;  %v499_v8 = vld [vmem:[#allocation4 + $0x68] sm:$0xff]  ;;  %v746_v15 = vld [vmem:[%s2025_s5 + $0x48] sm:$0xff] }
  0x23   :  { %v741_v13 = vld [vmem:[%s2025_s5 + $0x20] sm:$0xff]  ;;  %v1357_v16 = vpack.c.bf16 %v496_v7, %v494_v6  ;;  %v1359_v18 = vpack.c.bf16 %v501_v10, %v499_v8  ;;  %v498_v19 = vld [vmem:[#allocation4 + $0x60] sm:$0xff]  ;;  %v515_v58 = vld [vmem:[#allocation4 + $0xe8] sm:$0xff] }
  0x24   :  { %v513_v47 = vld [vmem:[#allocation4 + $0xd8] sm:$0xff]  ;;  %v550_v50 = vld [vmem:[#allocation4 + $0x200] sm:$0xff]  ;;  %v556_v0 = vld [vmem:[#allocation4 + $0x230] sm:$0xff] }
  0x25   :  { %v557_v54 = vld [vmem:[#allocation4 + $0x238] sm:$0xff]  ;;  %v559_v1 = vld [vmem:[#allocation4 + $0x248] sm:$0xff]  ;;  %v516_v6 = vld [vmem:[#allocation4 + $0xf0] sm:$0xff] }
  0x26   :  { %v517_v59 = vld [vmem:[#allocation4 + $0xf8] sm:$0xff]  ;;  %v519_v7 = vld [vmem:[#allocation4 + $0x108] sm:$0xff] }
  0x27   :  { %v736_v60 = vld [vmem:[%s2021_s1] sm:$0xff]  ;;  %v1375_v4 = vpack.c.bf16 %v517_v59, %v515_v58 }
  0x28   :  { %v521_v8 = vld [vmem:[#allocation4 + $0x118] sm:$0xff] }
  0xa3   :  { %v70_v21 = vpop.xlane.xlu0 %69  ;;  %v74_v22 = vpop.xlane.xlu1 %73 }
  0xa4   :  { %v98_v26 = vrot.slane %v70_v21, %v97_v23  ;;  %v106_v29 = vrot.slane %v74_v22, %v97_v23  ;;  %v500_v21 = vld [vmem:[#allocation4 + $0x70] sm:$0xff]  ;;  %v503_v22 = vld [vmem:[#allocation4 + $0x88] sm:$0xff] }
  0xa7   :  { %v72_v24 = vpop.xlane.xlu0 %71  ;;  %v76_v25 = vpop.xlane.xlu1 %75 }
  0xa8   :  { %v102_v27 = vrot.slane %v72_v24, %v97_v23  ;;  %v110_v28 = vrot.slane %v76_v25, %v97_v23  ;;  %v1335_v24 = vpack.c.bf16 %v743_v14, %v741_v13  ;;  %v1337_v25 = vpack.c.bf16 %v748_v17, %v746_v15  ;;  %v560_v13 = vld [vmem:[#allocation4 + $0x250] sm:$0xff]  ;;  %v563_v14 = vld [vmem:[#allocation4 + $0x268] sm:$0xff] }
  0xa9   :  { %v1379_v17 = vpack.c.bf16 %v521_v8, %v519_v7  ;;  %v578_v8 = vld [vmem:[#allocation4 + $0x2e0] sm:$0xff] }
  0xaa   :  { %v128_v30 = vsel %vm127_vm1, %v102_v27, %v98_v26  ;;  %v745_v26 = vld [vmem:[%s2025_s5 + $0x40] sm:$0xff]  ;;  %v747_v27 = vld [vmem:[%s2025_s5 + $0x50] sm:$0xff] }
  0xab   :  { %v130_v31 = vsel %vm129_vm2, %v106_v29, %v128_v30  ;;  %v78_v32 = vpop.xlane.xlu0 %77  ;;  %v80_v33 = vpop.xlane.xlu1 %79  ;;  %v1361_v29 = vpack.c.bf16 %v500_v21, %v498_v19  ;;  %v520_v19 = vld [vmem:[#allocation4 + $0x110] sm:$0xff]  ;;  %v523_v21 = vld [vmem:[#allocation4 + $0x128] sm:$0xff] }
  0xac   :  { %v132_v34 = vsel %vm131_vm3, %v110_v28, %v130_v31  ;;  %v114_v35 = vrot.slane %v78_v32, %v97_v23  ;;  %v118_v36 = vrot.slane %v80_v33, %v97_v23  ;;  %v750_v28 = vld [vmem:[%s2025_s5 + $0x68] sm:$0xff]  ;;  %v504_v32 = vld [vmem:[#allocation4 + $0x90] sm:$0xff]  ;;  %v507_v33 = vld [vmem:[#allocation4 + $0xa8] sm:$0xff] }
  0xad   :  { %v502_v31 = vld [vmem:[#allocation4 + $0x80] sm:$0xff] }
  0xae   :  { %v134_v37 = vsel %vm133_vm4, %v114_v35, %v132_v34  ;;  %v509_v34 = vld [vmem:[#allocation4 + $0xb8] sm:$0xff]  ;;  %v1339_v35 = vpack.c.bf16 %v747_v27, %v745_v26  ;;  %v564_v26 = vld [vmem:[#allocation4 + $0x270] sm:$0xff]  ;;  %v567_v27 = vld [vmem:[#allocation4 + $0x288] sm:$0xff] }
  0xaf   :  { %v82_v38 = vpop.xlane.xlu0 %81  ;;  %v84_v39 = vpop.xlane.xlu1 %83  ;;  %v136_v42 = vsel %vm135_vm5, %v118_v36, %v134_v37  ;;  %v566_v36 = vld [vmem:[#allocation4 + $0x280] sm:$0xff] }
  0xb0   :  { %v122_v40 = vrot.slane %v82_v38, %v97_v23  ;;  %v126_v41 = vrot.slane %v84_v39, %v97_v23  ;;  %v505_v23 = vld [vmem:[#allocation4 + $0x98] sm:$0xff]  ;;  %v751_v39 = vld [vmem:[%s2025_s5 + $0x70] sm:$0x1] }
  0xb1   :  { %v1363_v30 = vpack.c.bf16 %v505_v23, %v503_v22  ;;  %v749_v38 = vld [vmem:[%s2025_s5 + $0x60] sm:$0xff] }
  0xb2   :  { %v138_v44 = vsel %vm137_vm6, %v122_v40, %v136_v42  ;;  %v551_v40 = vld [vmem:[#allocation4 + $0x208] sm:$0xff]  ;;  %v553_v42 = vld [vmem:[#allocation4 + $0x218] sm:$0xff]  ;;  %v1344_v48 = vpack.c.bf16 %v751_v39, %v749_v38 }
  0xb3   :  { %v140_v45 = vsel %vm139_vm7, %v126_v41, %v138_v44  ;;  %v1365_v41 = vpack.c.bf16 %v504_v32, %v502_v31  ;;  %v506_v44 = vld [vmem:[#allocation4 + $0xa0] sm:$0xff]  ;;  %v1411_v49 = vpack.c.bf16 %v553_v42, %v551_v40  ;;  %v525_v22 = vld [vmem:[#allocation4 + $0x138] sm:$0xff]  ;;  %v524_v31 = vld [vmem:[#allocation4 + $0x130] sm:$0xff] }
  0xb4   :  { %v142_v46 = vadd.f32 %v140_v45, %v68_v43  ;;  %v1367_v43 = vpack.c.bf16 %v509_v34, %v507_v33  ;;  %v508_v45 = vld [vmem:[#allocation4 + $0xb0] sm:$0xff]  ;;  %v527_v32 = vld [vmem:[#allocation4 + $0x148] sm:$0xff]  ;;  %v529_v33 = vld [vmem:[#allocation4 + $0x158] sm:$0xff] }
  0xb5   :  { %v1369_v53 = vpack.c.bf16 %v508_v45, %v506_v44  ;;  %v571_v38 = vld [vmem:[#allocation4 + $0x2a8] sm:$0xff]  ;;  %v573_v40 = vld [vmem:[#allocation4 + $0x2b8] sm:$0xff]  ;;  %v526_v42 = vld [vmem:[#allocation4 + $0x140] sm:$0xff] }
  0xb6   :  { %144 = vst.msk [vmem:[#allocation2] sm:$0xff] %vm58_vm0, %v142_v46  ;;  %v511_v46 = vld [vmem:[#allocation4 + $0xc8] sm:$0xff]  ;;  %v533_v45 = vld [vmem:[#allocation4 + $0x178] sm:$0xff] }
  0xb7   :  { %v531_v44 = vld [vmem:[#allocation4 + $0x168] sm:$0xff] }
  0xbd   :  { %v148_v56 = vld [vmem:[#allocation2] sm:$0xff] }
  0xbe   :  { %1282 = vmatmul.mubr.msk.f32.vlgmr.msra.gmra.mrb[0].mxu0 %vm58_vm0, %v148_v56  ;;  %1285 = vmatmul.mubr.msk.f32.vlgmr.msra.gmra.mrb[0].mxu1 %vm58_vm0, %v148_v56 }
  0xbf   :  { %274 = vmatpush1.msra.mxu0 %v151_v51  ;;  %337 = vmatprep.mubr.f32.mxu0 %v1671_v9  ;;  %v552_v51 = vld [vmem:[#allocation4 + $0x210] sm:$0xff] }
  0xc0   :  { %344 = vmatprep.subr.mxu0 %v154_v52  ;;  %1350 = vmatpush1.bf16.msra.mxu1 %v1349_v55  ;;  %v555_v52 = vld [vmem:[#allocation4 + $0x228] sm:$0xff]  ;;  %v1371_v55 = vpack.c.bf16 %v513_v47, %v511_v46  ;;  %v1413_v61 = vpack.c.bf16 %v552_v51, %v550_v50  ;;  %v1431_v47 = vpack.c.bf16 %v573_v40, %v571_v38  ;;  %v590_v38 = vld [vmem:[#allocation4 + $0x340] sm:$0xff] }
  0xc1   :  { %1352 = vmatprep.subr.bf16.mxu1 %v1351_v57  ;;  %v512_v57 = vld [vmem:[#allocation4 + $0xd0] sm:$0xff]  ;;  %v575_v50 = vld [vmem:[#allocation4 + $0x2c8] sm:$0xff] }
  0xc2   :  { %1283 = vmatmul.mubr.msk.f32.vlgmr.msra.gmra.mrb[2].mxu0 %vm58_vm0, %v148_v56  ;;  %v595_v40 = vld [vmem:[#allocation4 + $0x368] sm:$0xff] }
  0xc3   :  { %345 = vmatpush1.msra.mxu0 %v153_v62  ;;  %408 = vmatprep.mubr.f32.mxu0 %v1671_v9  ;;  %v1415_v62 = vpack.c.bf16 %v557_v54, %v555_v52  ;;  %v577_v52 = vld [vmem:[#allocation4 + $0x2d8] sm:$0xff]  ;;  %v530_v54 = vld [vmem:[#allocation4 + $0x160] sm:$0xff] }
  0xc4   :  { %1330 = vmatprep.subr.bf16.mxu0 %v1329_v63  ;;  %1354 = vmatpush1.bf16.msra.mxu1 %v1353_v3  ;;  %v554_v63 = vld [vmem:[#allocation4 + $0x220] sm:$0xff]  ;;  %v561_v3 = vld [vmem:[#allocation4 + $0x258] sm:$0xff]  ;;  %v1435_v59 = vpack.c.bf16 %v577_v52, %v575_v50  ;;  %v603_v52 = vld [vmem:[#allocation4 + $0x3a8] sm:$0xff] }
  0xc5   :  { %1356 = vmatprep.subr.bf16.mxu1 %v1355_v5  ;;  %v514_v5 = vld [vmem:[#allocation4 + $0xe0] sm:$0xff]  ;;  %v1417_v10 = vpack.c.bf16 %v556_v0, %v554_v63  ;;  %v581_v0 = vld [vmem:[#allocation4 + $0x2f8] sm:$0xff] }
  0xc6   :  { %1284 = vmatmul.mubr.msk.f32.vlgmr.msra.gmra.mrb[4].mxu0 %vm58_vm0, %v148_v56  ;;  %v510_v56 = vld [vmem:[#allocation4 + $0xc0] sm:$0xff]  ;;  %v1377_v15 = vpack.c.bf16 %v516_v6, %v514_v5  ;;  %v541_v5 = vld [vmem:[#allocation4 + $0x1b8] sm:$0xff] }
  0xc7   :  { %1332 = vmatpush1.bf16.msra.mxu0 %v1331_v11  ;;  %828 = vmatprep.mubr.f32.mxu0 %v1671_v9  ;;  %v752_v9 = vld [vmem:[%s2025_s5 + $0x78] sm:$0x1]  ;;  %v1373_v2 = vpack.c.bf16 %v512_v57, %v510_v56  ;;  %v1419_v11 = vpack.c.bf16 %v561_v3, %v559_v1  ;;  %v537_v57 = vld [vmem:[#allocation4 + $0x198] sm:$0xff]  ;;  %v536_v3 = vld [vmem:[#allocation4 + $0x190] sm:$0xff] }
  0xc8   :  { %1334 = vmatprep.subr.bf16.mxu0 %v1333_v12  ;;  %1358 = vmatpush1.bf16.msra.mxu1 %v1357_v16  ;;  %v1341_v37 = vpack.c.bf16 %v752_v9, %v750_v28  ;;  %v558_v12 = vld [vmem:[#allocation4 + $0x240] sm:$0xff]  ;;  %v565_v16 = vld [vmem:[#allocation4 + $0x278] sm:$0xff]  ;;  %v1383_v9 = vpack.c.bf16 %v525_v22, %v523_v21  ;;  %v535_v56 = vld [vmem:[#allocation4 + $0x188] sm:$0xff] }
  0xc9   :  { %1360 = vmatprep.subr.bf16.mxu1 %v1359_v18  ;;  %v518_v18 = vld [vmem:[#allocation4 + $0x100] sm:$0xff]  ;;  %v1421_v23 = vpack.c.bf16 %v560_v13, %v558_v12  ;;  %v1395_v1 = vpack.c.bf16 %v537_v57, %v535_v56  ;;  %v585_v13 = vld [vmem:[#allocation4 + $0x318] sm:$0xff]  ;;  %v604_v57 = vld [vmem:[#allocation4 + $0x3b0] sm:$0xff] }
  0xca   :  { %v1381_v28 = vpack.c.bf16 %v520_v19, %v518_v18  ;;  %v545_v18 = vld [vmem:[#allocation4 + $0x1d8] sm:$0xff]  ;;  %v582_v22 = vld [vmem:[#allocation4 + $0x300] sm:$0xff] }
  0xcb   :  { %1336 = vmatpush1.bf16.msra.mxu0 %v1335_v24  ;;  %v1423_v24 = vpack.c.bf16 %v565_v16, %v563_v14  ;;  %v540_v16 = vld [vmem:[#allocation4 + $0x1b0] sm:$0xff]  ;;  %v598_v50 = vld [vmem:[#allocation4 + $0x380] sm:$0xff] }
  0xcc   :  { %1338 = vmatprep.subr.bf16.mxu0 %v1337_v25  ;;  %1362 = vmatpush1.bf16.msra.mxu1 %v1361_v29  ;;  %v562_v25 = vld [vmem:[#allocation4 + $0x260] sm:$0xff]  ;;  %v569_v29 = vld [vmem:[#allocation4 + $0x298] sm:$0xff] }
  0xcd   :  { %1364 = vmatprep.subr.bf16.mxu1 %v1363_v30  ;;  %v522_v30 = vld [vmem:[#allocation4 + $0x120] sm:$0xff]  ;;  %v1425_v34 = vpack.c.bf16 %v564_v26, %v562_v25  ;;  %v589_v26 = vld [vmem:[#allocation4 + $0x338] sm:$0xff] }
  0xce   :  { %v1385_v39 = vpack.c.bf16 %v524_v31, %v522_v30  ;;  %v586_v31 = vld [vmem:[#allocation4 + $0x320] sm:$0xff] }
  0xcf   :  { %1340 = vmatpush1.bf16.msra.mxu0 %v1339_v35  ;;  %v1427_v35 = vpack.c.bf16 %v569_v29, %v567_v27  ;;  %v544_v29 = vld [vmem:[#allocation4 + $0x1d0] sm:$0xff]  ;;  %v602_v56 = vld [vmem:[#allocation4 + $0x3a0] sm:$0xff] }
  0xd0   :  { %1343 = vmatprep.subr.msk.bf16.mxu0 %vm1853_vm10, %v1341_v37  ;;  %1366 = vmatpush1.bf16.msra.mxu1 %v1365_v41  ;;  %v568_v37 = vld [vmem:[#allocation4 + $0x290] sm:$0xff]  ;;  %v1387_v41 = vpack.c.bf16 %v529_v33, %v527_v32 }
  0xd1   :  { %1368 = vmatprep.subr.bf16.mxu1 %v1367_v43  ;;  %v528_v43 = vld [vmem:[#allocation4 + $0x150] sm:$0xff]  ;;  %v1429_v46 = vpack.c.bf16 %v568_v37, %v566_v36 }
  0xd2   :  { %v1389_v51 = vpack.c.bf16 %v528_v43, %v526_v42  ;;  %v588_v32 = vld [vmem:[#allocation4 + $0x330] sm:$0xff] }
  0xd3   :  { %1346 = vmatpush1.bf16.msk.msra.mxu0 %vm1853_vm10, %v1344_v48  ;;  %v570_v48 = vld [vmem:[#allocation4 + $0x2a0] sm:$0xff]  ;;  %v1449_v36 = vpack.c.bf16 %v588_v32, %v586_v31 }
  0xd4   :  { %1412 = vmatprep.subr.bf16.mxu0 %v1411_v49  ;;  %1370 = vmatpush1.bf16.msra.mxu1 %v1369_v53  ;;  %v572_v49 = vld [vmem:[#allocation4 + $0x2b0] sm:$0xff]  ;;  %v1391_v53 = vpack.c.bf16 %v533_v45, %v531_v44  ;;  %v594_v44 = vld [vmem:[#allocation4 + $0x360] sm:$0xff] }
  0xd5   :  { %1372 = vmatprep.subr.bf16.mxu1 %v1371_v55  ;;  %v532_v55 = vld [vmem:[#allocation4 + $0x170] sm:$0xff]  ;;  %v1433_v58 = vpack.c.bf16 %v572_v49, %v570_v48 }
  0xd6   :  { %1288 = vmatmul.mubr.msk.f32.vlgmr.msra.gmra.mrb[6].mxu0 %vm753_vm11, %v736_v60  ;;  %v574_v60 = vld [vmem:[#allocation4 + $0x2c0] sm:$0xff]  ;;  %v1393_v63 = vpack.c.bf16 %v532_v55, %v530_v54  ;;  %v596_v45 = vld [vmem:[#allocation4 + $0x370] sm:$0xff] }
  0xd7   :  { %1414 = vmatpush1.bf16.msra.mxu0 %v1413_v61  ;;  %v576_v61 = vld [vmem:[#allocation4 + $0x2d0] sm:$0xff]  ;;  %v1457_v48 = vpack.c.bf16 %v596_v45, %v594_v44 }
  0xd8   :  { %1416 = vmatprep.subr.bf16.mxu0 %v1415_v62  ;;  %1374 = vmatpush1.bf16.msra.mxu1 %v1373_v2  ;;  %v579_v62 = vld [vmem:[#allocation4 + $0x2e8] sm:$0xff]  ;;  %v534_v2 = vld [vmem:[#allocation4 + $0x180] sm:$0xff]  ;;  %v1437_v6 = vpack.c.bf16 %v576_v61, %v574_v60  ;;  %v549_v60 = vld [vmem:[#allocation4 + $0x1f8] sm:$0xff] }
  0xd9   :  { %1376 = vmatprep.subr.bf16.mxu1 %v1375_v4  ;;  %v539_v4 = vld [vmem:[#allocation4 + $0x1a8] sm:$0xff]  ;;  %v1439_v7 = vpack.c.bf16 %v581_v0, %v579_v62  ;;  %v1397_v12 = vpack.c.bf16 %v536_v3, %v534_v2  ;;  %v546_v0 = vld [vmem:[#allocation4 + $0x1e0] sm:$0xff] }
  0xda   :  { %v1399_v14 = vpack.c.bf16 %v541_v5, %v539_v4  ;;  %v607_v61 = vld [vmem:[#allocation4 + $0x3c8] sm:$0xff]  ;;  %v606_v4 = vld [vmem:[#allocation4 + $0x3c0] sm:$0xff]  ;;  %v608_v5 = vld [vmem:[#allocation4 + $0x3d0] sm:$0xff] }
  0xdb   :  { %1418 = vmatpush1.bf16.msra.mxu0 %v1417_v10  ;;  %v580_v10 = vld [vmem:[#allocation4 + $0x2f0] sm:$0xff] }
  0xdc   :  { %1420 = vmatprep.subr.bf16.mxu0 %v1419_v11  ;;  %1378 = vmatpush1.bf16.msra.mxu1 %v1377_v15  ;;  %v583_v11 = vld [vmem:[#allocation4 + $0x308] sm:$0xff]  ;;  %v538_v15 = vld [vmem:[#allocation4 + $0x1a0] sm:$0xff]  ;;  %v1441_v19 = vpack.c.bf16 %v580_v10, %v578_v8  ;;  %v613_v8 = vld [vmem:[#allocation4 + $0x3f8] sm:$0xff] }
  0xdd   :  { %1380 = vmatprep.subr.bf16.mxu1 %v1379_v17  ;;  %v543_v17 = vld [vmem:[#allocation4 + $0x1c8] sm:$0xff]  ;;  %v1443_v21 = vpack.c.bf16 %v585_v13, %v583_v11  ;;  %v1401_v25 = vpack.c.bf16 %v540_v16, %v538_v15  ;;  %v610_v13 = vld [vmem:[#allocation4 + $0x3e0] sm:$0xff] }
  0xde   :  { %v1403_v27 = vpack.c.bf16 %v545_v18, %v543_v17  ;;  %v679_v10 = vld [vmem:[#allocation4 + $0x608] sm:$0xff]  ;;  %v617_v18 = vld [vmem:[#allocation4 + $0x418] sm:$0xff] }
  0xdf   :  { %1422 = vmatpush1.bf16.msra.mxu0 %v1421_v23  ;;  %v584_v23 = vld [vmem:[#allocation4 + $0x310] sm:$0xff]  ;;  %v615_v17 = vld [vmem:[#allocation4 + $0x408] sm:$0xff] }
  0xe0   :  { %1424 = vmatprep.subr.bf16.mxu0 %v1423_v24  ;;  %1382 = vmatpush1.bf16.msra.mxu1 %v1381_v28  ;;  %v587_v24 = vld [vmem:[#allocation4 + $0x328] sm:$0xff]  ;;  %v542_v28 = vld [vmem:[#allocation4 + $0x1c0] sm:$0xff] }
  0xe1   :  { %1384 = vmatprep.subr.bf16.mxu1 %v1383_v9  ;;  %v1445_v9 = vpack.c.bf16 %v584_v23, %v582_v22  ;;  %v1447_v30 = vpack.c.bf16 %v589_v26, %v587_v24  ;;  %v1405_v33 = vpack.c.bf16 %v544_v29, %v542_v28  ;;  %v1874_v22 = vld [vmem:[%s2023_s3] sm:$0xff]  ;;  %v161_v23 = vsub.s32 0, %v1791_v20  ;;  %v678_v29 = vld [vmem:[#allocation4 + $0x600] sm:$0xff] }
  0xe2   :  { %v189_v24 = vsub.s32 7, %v1791_v20  ;;  %v173_v26 = vsub.s32 3, %v1791_v20  ;;  %v169_v28 = vsub.s32 2, %v1791_v20 }
  0xe3   :  { %1426 = vmatpush1.bf16.msra.mxu0 %v1425_v34  ;;  %v591_v34 = vld [vmem:[#allocation4 + $0x348] sm:$0xff] }
  0xe4   :  { %1428 = vmatprep.subr.bf16.mxu0 %v1427_v35  ;;  %1386 = vmatpush1.bf16.msra.mxu1 %v1385_v39  ;;  %v593_v35 = vld [vmem:[#allocation4 + $0x358] sm:$0xff]  ;;  %v592_v39 = vld [vmem:[#allocation4 + $0x350] sm:$0xff]  ;;  %v190_v32 = vrot.slane %v1874_v22, %v189_v24  ;;  %v170_v44 = vrot.slane %v1874_v22, %v169_v28  ;;  %v695_v24 = vld [vmem:[#allocation4 + $0x688] sm:$0xff] }
  0xe5   :  { %1388 = vmatprep.subr.bf16.mxu1 %v1387_v41  ;;  %v1451_v37 = vpack.c.bf16 %v593_v35, %v591_v34  ;;  %v597_v41 = vld [vmem:[#allocation4 + $0x378] sm:$0xff]  ;;  %v1453_v42 = vpack.c.bf16 %v592_v39, %v590_v38  ;;  %v174_v38 = vrot.slane %v1874_v22, %v173_v26  ;;  %v626_v28 = vld [vmem:[#allocation4 + $0x460] sm:$0xff] }
  0xe6   :  { %v1455_v43 = vpack.c.bf16 %v597_v41, %v595_v40  ;;  %v685_v34 = vld [vmem:[#allocation4 + $0x638] sm:$0xff]  ;;  %v181_v40 = vsub.s32 5, %v1791_v20  ;;  %v614_v41 = vld [vmem:[#allocation4 + $0x400] sm:$0xff] }
  0xe7   :  { %1430 = vmatpush1.bf16.msra.mxu0 %v1429_v46  ;;  %v599_v46 = vld [vmem:[#allocation4 + $0x388] sm:$0xff] }
  0xe8   :  { %1432 = vmatprep.subr.bf16.mxu0 %v1431_v47  ;;  %1390 = vmatpush1.bf16.msra.mxu1 %v1389_v51  ;;  %v601_v47 = vld [vmem:[#allocation4 + $0x398] sm:$0xff]  ;;  %v600_v51 = vld [vmem:[#allocation4 + $0x390] sm:$0xff] }
  0xe9   :  { %1392 = vmatprep.subr.bf16.mxu1 %v1391_v53  ;;  %v1459_v49 = vpack.c.bf16 %v601_v47, %v599_v46  ;;  %v605_v53 = vld [vmem:[#allocation4 + $0x3b8] sm:$0xff]  ;;  %v1461_v54 = vpack.c.bf16 %v600_v51, %v598_v50  ;;  %v682_v46 = vld [vmem:[#allocation4 + $0x620] sm:$0xff]  ;;  %v684_v47 = vld [vmem:[#allocation4 + $0x630] sm:$0xff] }
  0xea   :  { %v1463_v55 = vpack.c.bf16 %v605_v53, %v603_v52  ;;  %v621_v51 = vld [vmem:[#allocation4 + $0x438] sm:$0xff]  ;;  %v687_v52 = vld [vmem:[#allocation4 + $0x648] sm:$0xff] }
  0xeb   :  { %1434 = vmatpush1.bf16.msra.mxu0 %v1433_v58  ;;  %v1465_v58 = vpack.c.bf16 %v604_v57, %v602_v56  ;;  %v689_v53 = vld [vmem:[#allocation4 + $0x658] sm:$0xff]  ;;  %v182_v57 = vrot.slane %v1874_v22, %v181_v40  ;;  %v630_v40 = vld [vmem:[#allocation4 + $0x480] sm:$0xff] }
  0xec   :  { %1436 = vmatprep.subr.bf16.mxu0 %v1435_v59  ;;  %1394 = vmatpush1.bf16.msra.mxu1 %v1393_v63  ;;  %v547_v59 = vld [vmem:[#allocation4 + $0x1e8] sm:$0xff]  ;;  %v609_v63 = vld [vmem:[#allocation4 + $0x3d8] sm:$0xff] }
  0xed   :  { %1396 = vmatprep.subr.bf16.mxu1 %v1395_v1  ;;  %v1407_v62 = vpack.c.bf16 %v549_v60, %v547_v59  ;;  %v548_v1 = vld [vmem:[#allocation4 + $0x1f0] sm:$0xff]  ;;  %v1467_v2 = vpack.c.bf16 %v609_v63, %v607_v61  ;;  %v618_v59 = vld [vmem:[#allocation4 + $0x420] sm:$0xff]  ;;  %v1547_v63 = vpack.c.bf16 %v689_v53, %v687_v52 }
  0xee   :  { %v1409_v3 = vpack.c.bf16 %v548_v1, %v546_v0  ;;  %v620_v60 = vld [vmem:[#allocation4 + $0x430] sm:$0xff]  ;;  %v686_v0 = vld [vmem:[#allocation4 + $0x640] sm:$0xff] }
  0xef   :  { %1438 = vmatpush1.bf16.msra.mxu0 %v1437_v6  ;;  %v1469_v6 = vpack.c.bf16 %v608_v5, %v606_v4  ;;  %v688_v1 = vld [vmem:[#allocation4 + $0x650] sm:$0xff]  ;;  %v625_v4 = vld [vmem:[#allocation4 + $0x458] sm:$0xff]  ;;  %v691_v5 = vld [vmem:[#allocation4 + $0x668] sm:$0xff] }
  0xf0   :  { %1440 = vmatprep.subr.bf16.mxu0 %v1439_v7  ;;  %1398 = vmatpush1.bf16.msra.mxu1 %v1397_v12  ;;  %v611_v7 = vld [vmem:[#allocation4 + $0x3e8] sm:$0xff]  ;;  %v681_v12 = vld [vmem:[#allocation4 + $0x618] sm:$0xff]  ;;  %v634_v52 = vld [vmem:[#allocation4 + $0x4a0] sm:$0xff] }
  0xf1   :  { %1400 = vmatprep.subr.bf16.mxu1 %v1399_v14  ;;  %v1471_v11 = vpack.c.bf16 %v613_v8, %v611_v7  ;;  %v612_v14 = vld [vmem:[#allocation4 + $0x3f0] sm:$0xff]  ;;  %v1539_v15 = vpack.c.bf16 %v681_v12, %v679_v10  ;;  %v1481_v10 = vpack.c.bf16 %v620_v60, %v618_v59  ;;  %v622_v12 = vld [vmem:[#allocation4 + $0x440] sm:$0xff]  ;;  %v641_v59 = vld [vmem:[#allocation4 + $0x4d8] sm:$0xff] }
  0xf2   :  { %v1473_v16 = vpack.c.bf16 %v612_v14, %v610_v13  ;;  %v624_v13 = vld [vmem:[#allocation4 + $0x450] sm:$0xff]  ;;  %v707_v60 = vld [vmem:[#allocation4 + $0x6e8] sm:$0xff] }
  0xf3   :  { %1442 = vmatpush1.bf16.msra.mxu0 %v1441_v19  ;;  %v1475_v19 = vpack.c.bf16 %v617_v18, %v615_v17  ;;  %v692_v17 = vld [vmem:[#allocation4 + $0x670] sm:$0xff]  ;;  %v627_v18 = vld [vmem:[#allocation4 + $0x468] sm:$0xff]  ;;  %v1485_v26 = vpack.c.bf16 %v624_v13, %v622_v12  ;;  %v713_v13 = vld [vmem:[#allocation4 + $0x718] sm:$0xff] }
  0xf4   :  { %1444 = vmatprep.subr.bf16.mxu0 %v1443_v21  ;;  %1402 = vmatpush1.bf16.msra.mxu1 %v1401_v25  ;;  %v165_v21 = vsub.s32 1, %v1791_v20  ;;  %v636_v53 = vld [vmem:[#allocation4 + $0x4b0] sm:$0xff]  ;;  %v711_v12 = vld [vmem:[#allocation4 + $0x708] sm:$0xff] }
  0xf5   :  { %1404 = vmatprep.subr.bf16.mxu1 %v1403_v27  ;;  %v162_v27 = vrot.slane %v1874_v22, %v161_v23 }
  0xf6   :  { %v166_v25 = vrot.slane %v1874_v22, %v165_v21 }
  0xf7   :  { %1446 = vmatpush1.bf16.msra.mxu0 %v1445_v9  ;;  %v680_v9 = vld [vmem:[#allocation4 + $0x610] sm:$0xff] }
  0xf8   :  { %1448 = vmatprep.subr.bf16.mxu0 %v1447_v30  ;;  %1406 = vmatpush1.bf16.msra.mxu1 %v1405_v33  ;;  %v683_v33 = vld [vmem:[#allocation4 + $0x628] sm:$0xff]  ;;  %v1541_v39 = vpack.c.bf16 %v680_v9, %v678_v29  ;;  %v628_v29 = vld [vmem:[#allocation4 + $0x470] sm:$0xff] }
  0xf9   :  { %1408 = vmatprep.subr.bf16.mxu1 %v1407_v62  ;;  %v1543_v45 = vpack.c.bf16 %v685_v34, %v683_v33  ;;  %v696_v33 = vld [vmem:[#allocation4 + $0x690] sm:$0xff]  ;;  %v631_v34 = vld [vmem:[#allocation4 + $0x488] sm:$0xff] }
  0xfb   :  { %1450 = vmatpush1.bf16.msra.mxu0 %v1449_v36 }
  0xfc   :  { %1452 = vmatprep.subr.bf16.mxu0 %v1451_v37  ;;  %1410 = vmatpush1.bf16.msra.mxu1 %v1409_v3 }
  0xfd   :  { %1540 = vmatprep.subr.bf16.mxu1 %v1539_v15 }
  0xff   :  { %1454 = vmatpush1.bf16.msra.mxu0 %v1453_v42  ;;  %v616_v42 = vld [vmem:[#allocation4 + $0x410] sm:$0xff] }
 0x100   :  { %1456 = vmatprep.subr.bf16.mxu0 %v1455_v43 }
 0x103   :  { %1458 = vmatpush1.bf16.msra.mxu0 %v1457_v48  ;;  %v619_v48 = vld [vmem:[#allocation4 + $0x428] sm:$0xff] }
 0x104   :  { %1460 = vmatprep.subr.bf16.mxu0 %v1459_v49  ;;  %v1479_v62 = vpack.c.bf16 %v621_v51, %v619_v48  ;;  %v703_v48 = vld [vmem:[#allocation4 + $0x6c8] sm:$0xff] }
 0x107   :  { %1462 = vmatpush1.bf16.msra.mxu0 %v1461_v54 }
 0x108   :  { %1464 = vmatprep.subr.bf16.mxu0 %v1463_v55  ;;  %v1477_v55 = vpack.c.bf16 %v616_v42, %v614_v41  ;;  %v632_v41 = vld [vmem:[#allocation4 + $0x490] sm:$0xff] }
 0x10b   :  { %1466 = vmatpush1.bf16.msra.mxu0 %v1465_v58  ;;  %v1545_v58 = vpack.c.bf16 %v684_v47, %v682_v46  ;;  %v635_v46 = vld [vmem:[#allocation4 + $0x4a8] sm:$0xff]  ;;  %v637_v47 = vld [vmem:[#allocation4 + $0x4b8] sm:$0xff] }
 0x10c   :  { %1468 = vmatprep.subr.bf16.mxu0 %v1467_v2  ;;  %v623_v2 = vld [vmem:[#allocation4 + $0x448] sm:$0xff] }
 0x10d   :  { %v1483_v14 = vpack.c.bf16 %v625_v4, %v623_v2  ;;  %v638_v2 = vld [vmem:[#allocation4 + $0x4c0] sm:$0xff]  ;;  %v640_v4 = vld [vmem:[#allocation4 + $0x4d0] sm:$0xff] }
 0x10f   :  { %1470 = vmatpush1.bf16.msra.mxu0 %v1469_v6  ;;  %v693_v6 = vld [vmem:[#allocation4 + $0x678] sm:$0xff] }
 0x110   :  { %1472 = vmatprep.subr.bf16.mxu0 %v1471_v11  ;;  %v1549_v11 = vpack.c.bf16 %v688_v1, %v686_v0  ;;  %v1551_v15 = vpack.c.bf16 %v693_v6, %v691_v5  ;;  %v1497_v0 = vpack.c.bf16 %v636_v53, %v634_v52  ;;  %v723_v52 = vld [vmem:[#allocation4 + $0x768] sm:$0xff]  ;;  %v725_v53 = vld [vmem:[#allocation4 + $0x778] sm:$0xff] }
 0x113   :  { %1474 = vmatpush1.bf16.msra.mxu0 %v1473_v16  ;;  %v690_v16 = vld [vmem:[#allocation4 + $0x660] sm:$0xff] }
 0x114   :  { %1476 = vmatprep.subr.bf16.mxu0 %v1475_v19  ;;  %v629_v19 = vld [vmem:[#allocation4 + $0x478] sm:$0xff] }
 0x115   :  { %v1487_v9 = vpack.c.bf16 %v629_v19, %v627_v18  ;;  %v1571_v19 = vpack.c.bf16 %v713_v13, %v711_v12  ;;  %v726_v12 = vld [vmem:[#allocation4 + $0x780] sm:$0xff]  ;;  %v728_v13 = vld [vmem:[#allocation4 + $0x790] sm:$0xff] }
 0x191   :  { %v268_v30 = vpop.f32.mrb[0].mxu0  ;;  %v1886_v31 = vpop.f32.mrb[0].mxu1 }
 0x192   :  { %v270_v35 = vpop.f32.mrb[1].mxu0  ;;  %v483_v36 = vpop.f32.mrb[1].mxu1  ;;  %v269_v43 = vadd.f32 %v268_v30, %v162_v27  ;;  %v1553_v27 = vpack.c.bf16 %v692_v17, %v690_v16  ;;  %v642_v16 = vld [vmem:[#allocation4 + $0x4e0] sm:$0xff]  ;;  %v644_v17 = vld [vmem:[#allocation4 + $0x4f0] sm:$0xff] }
 0x193   :  { %v271_v37 = vadd.f32 %v270_v35, %v166_v25  ;;  %v484_v49 = vadd.f32 %v483_v36, %v190_v32  ;;  %v697_v25 = vld [vmem:[#allocation4 + $0x698] sm:$0xff]  ;;  %v694_v32 = vld [vmem:[#allocation4 + $0x680] sm:$0xff]  ;;  %v699_v36 = vld [vmem:[#allocation4 + $0x6a8] sm:$0xff] }
 0x194   :  { %v1555_v30 = vpack.c.bf16 %v697_v25, %v695_v24  ;;  %v633_v35 = vld [vmem:[#allocation4 + $0x498] sm:$0xff]  ;;  %v710_v24 = vld [vmem:[#allocation4 + $0x700] sm:$0xff]  ;;  %v712_v25 = vld [vmem:[#allocation4 + $0x710] sm:$0xff] }
 0x195   :  { %v339_v50 = vpop.f32.mrb[2].mxu0  ;;  %903 = vmatprep.mubr.f32.mxu1 %v271_v37  ;;  %v701_v37 = vld [vmem:[#allocation4 + $0x6b8] sm:$0xff]  ;;  %v1491_v42 = vpack.c.bf16 %v633_v35, %v631_v34 }
 0x196   :  { %v341_v54 = vpop.f32.mrb[3].mxu0  ;;  %904 = vmatmul.mubr.f32.vlgmr.msra.gmra.mrb[2].mxu1 %v269_v43  ;;  %v340_v61 = vadd.f32 %v339_v50, %v170_v44  ;;  %v1559_v43 = vpack.c.bf16 %v701_v37, %v699_v36  ;;  %v698_v44 = vld [vmem:[#allocation4 + $0x6a0] sm:$0xff]  ;;  %v1493_v50 = vpack.c.bf16 %v632_v41, %v630_v40  ;;  %v716_v37 = vld [vmem:[#allocation4 + $0x730] sm:$0xff]  ;;  %v719_v40 = vld [vmem:[#allocation4 + $0x748] sm:$0xff] }
 0x197   :  { %v342_v56 = vadd.f32 %v341_v54, %v174_v38  ;;  %1542 = vmatpush1.bf16.msra.mxu1 %v1541_v39  ;;  %1289 = vmatprep.mubr.msk.f32.mxu1 %vm835_vm12, %v484_v49  ;;  %v1489_v38 = vpack.c.bf16 %v628_v29, %v626_v28  ;;  %v1557_v39 = vpack.c.bf16 %v696_v33, %v694_v32  ;;  %v705_v49 = vld [vmem:[#allocation4 + $0x6d8] sm:$0xff]  ;;  %v715_v28 = vld [vmem:[#allocation4 + $0x728] sm:$0xff]  ;;  %v646_v32 = vld [vmem:[#allocation4 + $0x500] sm:$0xff] }
 0x198   :  { %1544 = vmatprep.subr.bf16.mxu1 %v1543_v45  ;;  %v700_v45 = vld [vmem:[#allocation4 + $0x6b0] sm:$0xff]  ;;  %v1495_v54 = vpack.c.bf16 %v637_v47, %v635_v46  ;;  %v717_v29 = vld [vmem:[#allocation4 + $0x738] sm:$0xff]  ;;  %v714_v36 = vld [vmem:[#allocation4 + $0x720] sm:$0xff] }
 0x199   :  { %v1894_v3 = vpop.f32.mrb[4].mxu0  ;;  %974 = vmatprep.mubr.f32.mxu0 %v342_v56  ;;  %v1561_v51 = vpack.c.bf16 %v700_v45, %v698_v44  ;;  %v702_v56 = vld [vmem:[#allocation4 + $0x6c0] sm:$0xff]  ;;  %v648_v33 = vld [vmem:[#allocation4 + $0x510] sm:$0xff]  ;;  %v1575_v35 = vpack.c.bf16 %v717_v29, %v715_v28  ;;  %v721_v41 = vld [vmem:[#allocation4 + $0x758] sm:$0xff] }
 0x19a   :  { %v412_v7 = vpop.f32.mrb[5].mxu0  ;;  %975 = vmatmul.mubr.f32.vlgmr.msra.gmra.mrb[8].mxu0 %v340_v61  ;;  %v709_v61 = vld [vmem:[#allocation4 + $0x6f8] sm:$0xff]  ;;  %v650_v44 = vld [vmem:[#allocation4 + $0x520] sm:$0xff]  ;;  %v652_v45 = vld [vmem:[#allocation4 + $0x530] sm:$0xff]  ;;  %v1579_v47 = vpack.c.bf16 %v721_v41, %v719_v40 }
 0x19b   :  { %v413_v8 = vadd.f32 %v412_v7, %v182_v57  ;;  %1478 = vmatpush1.bf16.msra.mxu0 %v1477_v55  ;;  %1546 = vmatpush1.bf16.msra.mxu1 %v1545_v58  ;;  %v1563_v55 = vpack.c.bf16 %v705_v49, %v703_v48  ;;  %v704_v57 = vld [vmem:[#allocation4 + $0x6d0] sm:$0xff]  ;;  %v639_v58 = vld [vmem:[#allocation4 + $0x4c8] sm:$0xff]  ;;  %v1567_v6 = vpack.c.bf16 %v709_v61, %v707_v60  ;;  %v706_v7 = vld [vmem:[#allocation4 + $0x6e0] sm:$0xff] }
 0x19c   :  { %1480 = vmatprep.subr.bf16.mxu0 %v1479_v62  ;;  %1548 = vmatprep.subr.bf16.mxu1 %v1547_v63  ;;  %v1565_v1 = vpack.c.bf16 %v704_v57, %v702_v56  ;;  %v1499_v5 = vpack.c.bf16 %v641_v59, %v639_v58  ;;  %v718_v48 = vld [vmem:[#allocation4 + $0x740] sm:$0xff]  ;;  %v720_v49 = vld [vmem:[#allocation4 + $0x750] sm:$0xff]  ;;  %v1583_v59 = vpack.c.bf16 %v725_v53, %v723_v52  ;;  %v673_v40 = vld [vmem:[#allocation4 + $0x5d8] sm:$0xff] }
 0x19d   :  { %1045 = vmatprep.mubr.f32.mxu0 %v413_v8  ;;  %v708_v8 = vld [vmem:[#allocation4 + $0x6f0] sm:$0xff]  ;;  %v654_v56 = vld [vmem:[#allocation4 + $0x540] sm:$0xff] }
 0x19e   :  { %v656_v57 = vld [vmem:[#allocation4 + $0x550] sm:$0xff]  ;;  %v722_v60 = vld [vmem:[#allocation4 + $0x760] sm:$0xff] }
 0x19f   :  { %1482 = vmatpush1.bf16.msra.mxu0 %v1481_v10  ;;  %1550 = vmatpush1.bf16.msra.mxu1 %v1549_v11  ;;  %v643_v10 = vld [vmem:[#allocation4 + $0x4e8] sm:$0xff]  ;;  %v645_v11 = vld [vmem:[#allocation4 + $0x4f8] sm:$0xff]  ;;  %v724_v61 = vld [vmem:[#allocation4 + $0x770] sm:$0xff] }
 0x1a0   :  { %1484 = vmatprep.subr.bf16.mxu0 %v1483_v14  ;;  %1552 = vmatprep.subr.bf16.mxu1 %v1551_v15  ;;  %v1501_v14 = vpack.c.bf16 %v640_v4, %v638_v2  ;;  %v1569_v15 = vpack.c.bf16 %v708_v8, %v706_v7  ;;  %v1503_v18 = vpack.c.bf16 %v645_v11, %v643_v10  ;;  %v727_v2 = vld [vmem:[#allocation4 + $0x788] sm:$0xff]  ;;  %v729_v4 = vld [vmem:[#allocation4 + $0x798] sm:$0xff]  ;;  %v658_v7 = vld [vmem:[#allocation4 + $0x560] sm:$0xff] }
 0x1a1   :  { %v660_v8 = vld [vmem:[#allocation4 + $0x570] sm:$0xff]  ;;  %v1587_v11 = vpack.c.bf16 %v729_v4, %v727_v2  ;;  %v730_v28 = vld [vmem:[#allocation4 + $0x7a0] sm:$0xff] }
 0x1a2   :  { %v732_v29 = vld [vmem:[#allocation4 + $0x7b0] sm:$0xff]  ;;  %v674_v53 = vld [vmem:[#allocation4 + $0x5e0] sm:$0xff] }
 0x1a3   :  { %1486 = vmatpush1.bf16.msra.mxu0 %v1485_v26  ;;  %1554 = vmatpush1.bf16.msra.mxu1 %v1553_v27  ;;  %v647_v26 = vld [vmem:[#allocation4 + $0x508] sm:$0xff]  ;;  %v649_v27 = vld [vmem:[#allocation4 + $0x518] sm:$0xff] }
 0x1a4   :  { %1488 = vmatprep.subr.bf16.mxu0 %v1487_v9  ;;  %1556 = vmatprep.subr.bf16.mxu1 %v1555_v30  ;;  %v1505_v9 = vpack.c.bf16 %v644_v17, %v642_v16  ;;  %v1573_v30 = vpack.c.bf16 %v712_v25, %v710_v24  ;;  %v1507_v34 = vpack.c.bf16 %v649_v27, %v647_v26  ;;  %v731_v16 = vld [vmem:[#allocation4 + $0x7a8] sm:$0xff]  ;;  %v733_v17 = vld [vmem:[#allocation4 + $0x7b8] sm:$0xff]  ;;  %v662_v24 = vld [vmem:[#allocation4 + $0x580] sm:$0xff] }
 0x1a5   :  { %v1591_v26 = vpack.c.bf16 %v733_v17, %v731_v16  ;;  %v664_v27 = vld [vmem:[#allocation4 + $0x590] sm:$0xff]  ;;  %v1141_v2 = vld [vmem:[%s2027_s7 + $0x10] sm:$0xff] }
 0x1a6   :  { %v1142_v4 = vld [vmem:[%s2027_s7 + $0x18] sm:$0xff]  ;;  %v1145_v16 = vld [vmem:[%s2027_s7 + $0x30] sm:$0xff] }
 0x1a7   :  { %1490 = vmatpush1.bf16.msra.mxu0 %v1489_v38  ;;  %1558 = vmatpush1.bf16.msra.mxu1 %v1557_v39  ;;  %v651_v38 = vld [vmem:[#allocation4 + $0x528] sm:$0xff]  ;;  %v653_v39 = vld [vmem:[#allocation4 + $0x538] sm:$0xff] }
 0x1a8   :  { %1492 = vmatprep.subr.bf16.mxu0 %v1491_v42  ;;  %1560 = vmatprep.subr.bf16.mxu1 %v1559_v43  ;;  %v1509_v42 = vpack.c.bf16 %v648_v33, %v646_v32  ;;  %v1577_v43 = vpack.c.bf16 %v716_v37, %v714_v36  ;;  %v1511_v46 = vpack.c.bf16 %v653_v39, %v651_v38  ;;  %v185_v32 = vsub.s32 6, %v1791_v20  ;;  %v666_v36 = vld [vmem:[#allocation4 + $0x5a0] sm:$0xff]  ;;  %v668_v37 = vld [vmem:[#allocation4 + $0x5b0] sm:$0xff]  ;;  %v735_v38 = vld [vmem:[#allocation4 + $0x7c8] sm:$0xff] }
 0x1a9   :  { %v1896_v62 = vpop.f32.mrb[6].mxu0  ;;  %v1525_v33 = vpack.c.bf16 %v664_v27, %v662_v24  ;;  %v671_v39 = vld [vmem:[#allocation4 + $0x5c8] sm:$0xff]  ;;  %v1164_v24 = vld [vmem:[%s2027_s7 + $0xc8] sm:$0xff] }
 0x1aa   :  { %v1898_v63 = vpop.f32.mrb[7].mxu0  ;;  %v186_v41 = vrot.slane %v1874_v22, %v185_v32  ;;  %v1146_v17 = vld [vmem:[%s2027_s7 + $0x38] sm:$0xff]  ;;  %v1148_v27 = vld [vmem:[%s2027_s7 + $0x48] sm:$0xff]  ;;  %v1149_v32 = vld [vmem:[%s2027_s7 + $0x50] sm:$0xff] }
 0x1ab   :  { %1494 = vmatpush1.bf16.msra.mxu0 %v1493_v50  ;;  %1562 = vmatpush1.bf16.msra.mxu1 %v1561_v51  ;;  %v655_v50 = vld [vmem:[#allocation4 + $0x548] sm:$0xff]  ;;  %v657_v51 = vld [vmem:[#allocation4 + $0x558] sm:$0xff] }
 0x1ac   :  { %1496 = vmatprep.subr.bf16.mxu0 %v1495_v54  ;;  %1564 = vmatprep.subr.bf16.mxu1 %v1563_v55  ;;  %v1513_v54 = vpack.c.bf16 %v652_v45, %v650_v44  ;;  %v1581_v55 = vpack.c.bf16 %v720_v49, %v718_v48  ;;  %v1515_v58 = vpack.c.bf16 %v657_v51, %v655_v50  ;;  %v670_v45 = vld [vmem:[#allocation4 + $0x5c0] sm:$0xff]  ;;  %v677_v48 = vld [vmem:[#allocation4 + $0x5f8] sm:$0xff]  ;;  %v177_v51 = vsub.s32 4, %v1791_v20  ;;  %v1291_v20 = vld [vmem:[%s2029_s9] ss:$0 sm:$0xff] }
 0x1ad   :  { %v1531_v44 = vpack.c.bf16 %v673_v40, %v671_v39  ;;  %v482_v49 = vadd.f32 %v1886_v31, %v186_v41  ;;  %v1155_v31 = vld [vmem:[%s2027_s7 + $0x80] sm:$0xff]  ;;  %v1152_v39 = vld [vmem:[%s2027_s7 + $0x68] sm:$0xff]  ;;  %v1169_v41 = vld [vmem:[%s2027_s7 + $0xf0] sm:$0xff] }
 0x1af   :  { %1498 = vmatpush1.bf16.msra.mxu0 %v1497_v0  ;;  %1566 = vmatpush1.bf16.msra.mxu1 %v1565_v1  ;;  %v659_v0 = vld [vmem:[#allocation4 + $0x568] sm:$0xff]  ;;  %v661_v1 = vld [vmem:[#allocation4 + $0x578] sm:$0xff] }
 0x1b0   :  { %1500 = vmatprep.subr.bf16.mxu0 %v1499_v5  ;;  %1568 = vmatprep.subr.bf16.mxu1 %v1567_v6  ;;  %v1517_v5 = vpack.c.bf16 %v656_v57, %v654_v56  ;;  %v1585_v6 = vpack.c.bf16 %v724_v61, %v722_v60  ;;  %v1519_v10 = vpack.c.bf16 %v661_v1, %v659_v0  ;;  %v1158_v61 = vld [vmem:[%s2027_s7 + $0x98] sm:$0xff] }
 0x1b1   :  { %v178_v56 = vrot.slane %v1874_v22, %v177_v51  ;;  %v1140_v22 = vld [vmem:[%s2027_s7 + $0x8] sm:$0xff] }
 0x1b3   :  { %1502 = vmatpush1.bf16.msra.mxu0 %v1501_v14  ;;  %1570 = vmatpush1.bf16.msra.mxu1 %v1569_v15  ;;  %v663_v14 = vld [vmem:[#allocation4 + $0x588] sm:$0xff]  ;;  %v665_v15 = vld [vmem:[#allocation4 + $0x598] sm:$0xff]  ;;  %v411_v57 = vadd.f32 %v1894_v3, %v178_v56 }
 0x1b4   :  { %1504 = vmatprep.subr.bf16.mxu0 %v1503_v18  ;;  %1572 = vmatprep.subr.bf16.mxu1 %v1571_v19  ;;  %v1521_v18 = vpack.c.bf16 %v660_v8, %v658_v7  ;;  %v1589_v19 = vpack.c.bf16 %v728_v13, %v726_v12  ;;  %v1523_v25 = vpack.c.bf16 %v665_v15, %v663_v14  ;;  %v1157_v3 = vld [vmem:[%s2027_s7 + $0x90] sm:$0xff]  ;;  %v1162_v14 = vld [vmem:[%s2027_s7 + $0xb8] sm:$0xff] }
 0x1b5   :  { %v1599_v1 = vpack.c.bf16 %v1158_v61, %v1157_v3  ;;  %v1601_v7 = vpack.c.bf16 %v1142_v4, %v1141_v2  ;;  %v1161_v13 = vld [vmem:[%s2027_s7 + $0xb0] sm:$0xff] }
 0x1b6   :  { %v1607_v15 = vpack.c.bf16 %v1162_v14, %v1161_v13 }
 0x1b7   :  { %1506 = vmatpush1.bf16.msra.mxu0 %v1505_v9  ;;  %1574 = vmatpush1.bf16.msra.mxu1 %v1573_v30  ;;  %v667_v9 = vld [vmem:[#allocation4 + $0x5a8] sm:$0xff]  ;;  %v669_v30 = vld [vmem:[#allocation4 + $0x5b8] sm:$0xff] }
 0x1b8   :  { %1508 = vmatprep.subr.bf16.mxu0 %v1507_v34  ;;  %1576 = vmatprep.subr.bf16.mxu1 %v1575_v35  ;;  %v1593_v34 = vpack.c.bf16 %v732_v29, %v730_v28  ;;  %v1527_v35 = vpack.c.bf16 %v669_v30, %v667_v9  ;;  %v1165_v28 = vld [vmem:[%s2027_s7 + $0xd0] sm:$0xff]  ;;  %v1166_v29 = vld [vmem:[%s2027_s7 + $0xd8] sm:$0xff] }
 0x1b9   :  { %v1615_v30 = vpack.c.bf16 %v1166_v29, %v1165_v28 }
 0x1bb   :  { %1510 = vmatpush1.bf16.msra.mxu0 %v1509_v42  ;;  %1578 = vmatpush1.bf16.msra.mxu1 %v1577_v43  ;;  %v1529_v42 = vpack.c.bf16 %v668_v37, %v666_v36  ;;  %v734_v43 = vld [vmem:[#allocation4 + $0x7c0] sm:$0xff] }
 0x1bc   :  { %1512 = vmatprep.subr.bf16.mxu0 %v1511_v46  ;;  %1580 = vmatprep.subr.bf16.mxu1 %v1579_v47  ;;  %v672_v46 = vld [vmem:[#allocation4 + $0x5d0] sm:$0xff]  ;;  %v675_v47 = vld [vmem:[#allocation4 + $0x5e8] sm:$0xff]  ;;  %v1168_v36 = vld [vmem:[%s2027_s7 + $0xe8] sm:$0xff] }
 0x1bd   :  { %v1533_v50 = vpack.c.bf16 %v672_v46, %v670_v45  ;;  %v1535_v52 = vpack.c.bf16 %v677_v48, %v675_v47  ;;  %v1154_v45 = vld [vmem:[%s2027_s7 + $0x78] sm:$0xff] }
 0x1bf   :  { %1514 = vmatpush1.bf16.msra.mxu0 %v1513_v54  ;;  %1582 = vmatpush1.bf16.msra.mxu1 %v1581_v55  ;;  %v676_v54 = vld [vmem:[#allocation4 + $0x5f0] sm:$0xff] }
 0x1c0   :  { %1516 = vmatprep.subr.bf16.mxu0 %v1515_v58  ;;  %1584 = vmatprep.subr.bf16.mxu1 %v1583_v59  ;;  %v1537_v55 = vpack.c.bf16 %v676_v54, %v674_v53  ;;  %v1156_v58 = vld [vmem:[%s2027_s7 + $0x88] sm:$0xff]  ;;  %v1139_v59 = vld [vmem:[%s2027_s7] sm:$0xff] }
 0x1c1   :  { %v1595_v60 = vpack.c.bf16 %v1156_v58, %v1155_v31  ;;  %v1597_v0 = vpack.c.bf16 %v1140_v22, %v1139_v59  ;;  %v1123_v53 = vld [vmem:[%s2026_s6] sm:$0x3] }
 0x1c2   :  { %v1128_v56 = vrot.slane %v1123_v53, %v161_v23  ;;  %v1132_v58 = vrot.slane %v1123_v53, %v165_v21 }
 0x1c3   :  { %1518 = vmatpush1.bf16.msra.mxu0 %v1517_v5  ;;  %1586 = vmatpush1.bf16.msra.mxu1 %v1585_v6  ;;  %v1159_v5 = vld [vmem:[%s2027_s7 + $0xa0] sm:$0xff]  ;;  %v1160_v6 = vld [vmem:[%s2027_s7 + $0xa8] sm:$0xff] }
 0x1c4   :  { %1520 = vmatprep.subr.bf16.mxu0 %v1519_v10  ;;  %1588 = vmatprep.subr.bf16.mxu1 %v1587_v11  ;;  %v1603_v8 = vpack.c.bf16 %v1160_v6, %v1159_v5  ;;  %v1143_v10 = vld [vmem:[%s2027_s7 + $0x20] sm:$0xff]  ;;  %v1144_v11 = vld [vmem:[%s2027_s7 + $0x28] sm:$0xff] }
 0x1c5   :  { %v1605_v12 = vpack.c.bf16 %v1144_v11, %v1143_v10  ;;  %v1292_v6 = vld [vmem:[#allocation3] ss:$0 sm:$0xff] }
 0x1c7   :  { %1522 = vmatpush1.bf16.msra.mxu0 %v1521_v18  ;;  %1590 = vmatpush1.bf16.msra.mxu1 %v1589_v19  ;;  %v1609_v18 = vpack.c.bf16 %v1146_v17, %v1145_v16  ;;  %v1163_v19 = vld [vmem:[%s2027_s7 + $0xc0] sm:$0xff] }
 0x1c8   :  { %1524 = vmatprep.subr.bf16.mxu0 %v1523_v25  ;;  %1592 = vmatprep.subr.bf16.mxu1 %v1591_v26  ;;  %v1147_v25 = vld [vmem:[%s2027_s7 + $0x40] sm:$0xff]  ;;  %v1611_v26 = vpack.c.bf16 %v1164_v24, %v1163_v19 }
 0x1c9   :  { %v1613_v9 = vpack.c.bf16 %v1148_v27, %v1147_v25 }
 0x1cb   :  { %1526 = vmatpush1.bf16.msra.mxu0 %v1525_v33  ;;  %1594 = vmatpush1.bf16.msra.mxu1 %v1593_v34  ;;  %v1150_v33 = vld [vmem:[%s2027_s7 + $0x58] sm:$0xff] }
 0x1cc   :  { %1528 = vmatprep.subr.bf16.mxu0 %v1527_v35  ;;  %1108 = vmatprep.subr.mxu1 %v735_v38  ;;  %v1617_v34 = vpack.c.bf16 %v1150_v33, %v1149_v32  ;;  %v1167_v35 = vld [vmem:[%s2027_s7 + $0xe0] sm:$0xff] }
 0x1cd   :  { %v1619_v37 = vpack.c.bf16 %v1168_v36, %v1167_v35  ;;  %v1151_v38 = vld [vmem:[%s2027_s7 + $0x60] sm:$0xff] }
 0x1ce   :  { %v1621_v40 = vpack.c.bf16 %v1152_v39, %v1151_v38 }
 0x1cf   :  { %1530 = vmatpush1.bf16.msra.mxu0 %v1529_v42  ;;  %1109 = vmatpush1.msra.mxu1 %v734_v43  ;;  %v1170_v42 = vld [vmem:[%s2027_s7 + $0xf8] sm:$0xff] }
 0x1d0   :  { %1117 = vmatmul.mubr.f32.vlgmr.msra.gmra.mrb[4].mxu1 %v482_v49  ;;  %1532 = vmatprep.subr.bf16.mxu0 %v1531_v44  ;;  %v1623_v43 = vpack.c.bf16 %v1170_v42, %v1169_v41  ;;  %v1153_v44 = vld [vmem:[%s2027_s7 + $0x70] sm:$0xff] }
 0x1d1   :  { %1596 = vmatprep.subr.bf16.mxu1 %v1595_v60  ;;  %v1625_v46 = vpack.c.bf16 %v1154_v45, %v1153_v44 }
 0x1d2   :  { %1598 = vmatpush3.bf16.msra.mxu1 %v1597_v0  ;;  %v1290_v0 = vld [vmem:[%s2028_s8] ss:$0 sm:$0xff] }
 0x1d3   :  { %1534 = vmatpush1.bf16.msra.mxu0 %v1533_v50  ;;  %1600 = vmatprep.subr.bf16.mxu1 %v1599_v1 }
 0x1d4   :  { %1536 = vmatprep.subr.bf16.mxu0 %v1535_v52 }
 0x1d6   :  { %1602 = vmatpush3.bf16.msra.mxu1 %v1601_v7 }
 0x1d7   :  { %1538 = vmatpush1.bf16.msra.mxu0 %v1537_v55  ;;  %1604 = vmatprep.subr.bf16.mxu1 %v1603_v8 }
 0x1da   :  { %1046 = vmatmul.mubr.f32.vlgmr.msra.gmra.mrb[8].mxu0 %v411_v57  ;;  %1606 = vmatpush3.bf16.msra.mxu1 %v1605_v12 }
 0x1db   :  { %1608 = vmatprep.subr.bf16.mxu1 %v1607_v15 }
 0x1de   :  { %1610 = vmatpush3.bf16.msra.mxu1 %v1609_v18 }
 0x1df   :  { %1612 = vmatprep.subr.bf16.mxu1 %v1611_v26 }
 0x1e2   :  { %1614 = vmatpush3.bf16.msra.mxu1 %v1613_v9 }
 0x1e3   :  { %1616 = vmatprep.subr.bf16.mxu1 %v1615_v30 }
 0x1e6   :  { %1618 = vmatpush3.bf16.msra.mxu1 %v1617_v34 }
 0x1e7   :  { %1620 = vmatprep.subr.bf16.mxu1 %v1619_v37 }
 0x1ea   :  { %1622 = vmatpush3.bf16.msra.mxu1 %v1621_v40 }
 0x1eb   :  { %1624 = vmatprep.subr.bf16.mxu1 %v1623_v43 }
 0x1ee   :  { %1626 = vmatpush3.bf16.msra.mxu1 %v1625_v46 }
 0x269   :  { %v905_v47 = vpop.f32.mrb[2].mxu1 }
 0x26a   :  { %v906_v48 = vadd.f32 %v905_v47, %v1896_v62  ;;  %v907_v49 = vpop.f32.mrb[3].mxu1 }
 0x26b   :  { %v908_v50 = vadd.f32 %v907_v49, %v1898_v63 }
 0x2a3   :  { %v1118_v51 = vpop.f32.mrb[4].mxu1 }
 0x2a4   :  { %v1120_v52 = vpop.f32.mrb[5].mxu1 }
 0x2ad   :  { %v1047_v54 = vpop.f32.mrb[8].mxu0 }
 0x2ae   :  { %v1628_v55 = vadd.f32 %v1047_v54, %v906_v48  ;;  %v1049_v57 = vpop.f32.mrb[9].mxu0 }
 0x2af   :  { %v1631_v31 = vadd.f32 %v1049_v57, %v908_v50 }
 0x2b0   :  { %v1629_v62 = vadd.f32 %v1628_v55, %v1118_v51 }
 0x2b1   :  { %v1632_v59 = vadd.f32 %v1631_v31, %v1120_v52 }
 0x2b2   :  { %v1135_v60 = vadd.f32 %v1629_v62, %v1128_v56 }
 0x2b3   :  { %v1136_v63 = vadd.f32 %v1632_v59, %v1132_v58 }
 0x2b4   :  { %v1137_v3 = vmax.f32 %v1135_v60, 0.0 }
 0x2b5   :  { %v1138_v22 = vmax.f32 %v1136_v63, 0.0 }
 0x2b7   :  { %1242 = vmatprep.mubr.f32.mxu1 %v1138_v22 }
 0x2b8   :  { %1243 = vmatmul.mubr.f32.vlgmr.msra.gmra.mrb[6].mxu1 %v1137_v3 }
 0x38b   :  { %v1326_v61 = vpop.f32.mrb[6].mxu1 }
 0x38c   :  { %v1327_v1 = vpop.f32.mrb[7].mxu1 }
 0x38d   :  { %v1328_v23 = vadd.f32 %v1327_v1, %v1326_v61 }
 0x38f   :  { %v1245_v2 = vadd.f32 %v1328_v23, %v1290_v0 }
 0x391   :  { %v1248_v21 = vmax.f32 %v1245_v2, 0.0 }
 0x393   :  { %v1256_v4 = vmul.f32 %v1291_v20, %v1248_v21 }
 0x395   :  { %v1258_v5 = vsel %vm1257_vm13, %v1256_v4, 0.0 }
 0x396   :  { %1259 = vadd.xlane.f32.xlu0 %v1258_v5 }
 0x423   :  { %v1260_v7 = vpop.xlane.xlu0 %1259 }
 0x424   :  { %v1268_v8 = vadd.f32 %v1292_v6, %v1260_v7 }
 0x426   :  { %v1293_v10 = vmul.f32 -1.442695, %v1268_v8 }
 0x428   :  { %1640 = vpow2.f32 %v1293_v10 }
 0x432   :  { %v1641_v11 = vpop.eup %1640 }
 0x433   :  { %v1272_v12 = vadd.f32 1.0, %v1641_v11 }
 0x435   :  { %1642 = vrcp.f32 %v1272_v12 }
 0x43f   :  { %v1643_v13 = vpop.eup %1642 }
 0x440   :  { %1276 = vst.msk [vmem:[%s2031_s11] sm:$0xff] %vm1275_vm14, %v1643_v13 }
 0x441   :  { %1281 = vsyncpa [#allocation5], 1 }

</bundles_post_ra>
